<compile_context>
chip_gen: v6e
topology: v6e:2x2x1
jax: 0.10.0
libtpu: 0.0.40
codegen_flags: <defaults>
</compile_context>

<pallas_src>
import functools

import jax
import jax.numpy as jnp
from jax import lax
from jax.experimental import pallas as pl
from jax.experimental.pallas import tpu as pltpu


# -----------------------------------------------------------------------------
# Fused kernel: all GRU layers + FC, no grid, time loop inside.
# -----------------------------------------------------------------------------
def _gru_cell_step(xt, h, wih_ref, whh_ref, bih_ref, bhh_ref, H):
    """One GRU step on a (B, in) tile. PyTorch gate order: r, z, n."""
    gi = jnp.dot(xt, wih_ref[...], preferred_element_type=jnp.float32) + bih_ref[...]
    gh = jnp.dot(h, whh_ref[...], preferred_element_type=jnp.float32) + bhh_ref[...]
    r = jax.nn.sigmoid(gi[:, 0:H] + gh[:, 0:H])
    z = jax.nn.sigmoid(gi[:, H:2 * H] + gh[:, H:2 * H])
    n = jnp.tanh(gi[:, 2 * H:3 * H] + r * gh[:, 2 * H:3 * H])
    return (1.0 - z) * n + z * h


def _gru_model_kernel(*refs, num_layers, T, B, H):
    # Ref layout:
    #   refs[0]                      : x        (T, B, I)
    #   refs[1 + 4l : 5 + 4l]        : layer l  W_ih (in,3H), W_hh (H,3H),
    #                                           b_ih (1,3H),  b_hh (1,3H)
    #   refs[1 + 4L], refs[2 + 4L]   : fc_w_t (H, O), fc_b (1, O)
    #   refs[3 + 4L]                 : out (B, O)
    #   refs[4 + 4L]                 : VMEM scratch (T, B, H)  [if num_layers > 1]
    x_ref = refs[0]
    layer_refs = [refs[1 + 4 * l: 5 + 4 * l] for l in range(num_layers)]
    fcw_ref = refs[1 + 4 * num_layers]
    fcb_ref = refs[2 + 4 * num_layers]
    out_ref = refs[3 + 4 * num_layers]
    seq_ref = refs[4 + 4 * num_layers] if num_layers > 1 else None

    unroll = T <= 16
    h_last = None

    for layer in range(num_layers):
        wih_ref, whh_ref, bih_ref, bhh_ref = layer_refs[layer]
        is_last = layer == num_layers - 1

        if layer == 0:
            read = lambda t: x_ref[t].astype(jnp.float32)
        else:
            read = lambda t: seq_ref[t]

        def step(t, h, _read=read, _wih=wih_ref, _whh=whh_ref,
                 _bih=bih_ref, _bhh=bhh_ref, _write=(not is_last)):
            h_new = _gru_cell_step(_read(t), h, _wih, _whh, _bih, _bhh, H)
            if _write:
                # Safe in-place overwrite: step t of layer l only reads index t
                # (layer l-1 output) before writing layer l output at index t.
                seq_ref[t] = h_new
            return h_new

        h_last = lax.fori_loop(0, T, step, jnp.zeros((B, H), jnp.float32),
                               unroll=unroll)

    # Fused final Linear on the last time step's hidden state.
    out_ref[...] = (jnp.dot(h_last, fcw_ref[...],
                            preferred_element_type=jnp.float32)
                    + fcb_ref[...]).astype(out_ref.dtype)


def _full_spec(shape):
    ndim = len(shape)
    return pl.BlockSpec(shape, lambda _nd=ndim: (0,) * _nd)


@jax.jit
def gru_model_forward(x, params):
    """x: (B, T, input_size) batch_first, like PyTorch. Returns (B, output_size)."""
    B, T, I = x.shape
    num_layers = len(params["layers"])
    H = params["layers"][0]["whh"].shape[0]
    O = params["fc_w_t"].shape[1]

    # Pad batch to sublane granularity (>= 8) and go time-major so each step
    # reads one contiguous (B_pad, I) tile.
    B_pad = max(8, ((B + 7) // 8) * 8)
    x_p = jnp.pad(x.astype(jnp.float32), ((0, B_pad - B), (0, 0), (0, 0)))
    x_tbf = jnp.transpose(x_p, (1, 0, 2))                     # (T, B_pad, I)

    flat_inputs = [x_tbf]
    in_specs = [_full_spec((T, B_pad, I))]
    for lp in params["layers"]:
        for name in ("wih", "whh", "bih", "bhh"):
            a = lp[name]
            flat_inputs.append(a)
            in_specs.append(_full_spec(a.shape))
    flat_inputs += [params["fc_w_t"], params["fc_b"]]
    in_specs += [_full_spec(params["fc_w_t"].shape),
                 _full_spec(params["fc_b"].shape)]

    scratch_shapes = []
    if num_layers > 1:
        scratch_shapes.append(pltpu.VMEM((T, B_pad, H), jnp.float32))

    kernel = functools.partial(_gru_model_kernel, num_layers=num_layers,
                               T=T, B=B_pad, H=H)

    out = pl.pallas_call(
        kernel,
        out_shape=jax.ShapeDtypeStruct((B_pad, O), jnp.float32),
        in_specs=in_specs,
        out_specs=pl.BlockSpec((B_pad, O), lambda: (0, 0)),
        scratch_shapes=scratch_shapes,
    )(*flat_inputs)
    return out[:B]


# -----------------------------------------------------------------------------
# Parameter init: PyTorch-style uniform(-1/sqrt(H), 1/sqrt(H)), gates
# pre-concatenated as (in, 3H) / (H, 3H) in r, z, n order.
# -----------------------------------------------------------------------------
def init_params(key, input_size, hidden_size, num_layers, output_size):
    H = hidden_size
    bound = 1.0 / float(hidden_size) ** 0.5

    def u(k, shape):
        return jax.random.uniform(k, shape, jnp.float32, -bound, bound)

    layers = []
    for layer in range(num_layers):
        in_dim = input_size if layer == 0 else hidden_size
        key, k1, k2, k3, k4 = jax.random.split(key, 5)
        layers.append(dict(
            wih=u(k1, (in_dim, 3 * H)),   # transposed for x @ W
            whh=u(k2, (H, 3 * H)),
            bih=u(k3, (1, 3 * H)),
            bhh=u(k4, (1, 3 * H)),
        ))
    key, kw, kb = jax.random.split(key, 3)
    fc_w_t = u(kw, (H, output_size))
    fc_b = u(kb, (1, output_size))
    return dict(layers=layers, fc_w_t=fc_w_t, fc_b=fc_b)


# -----------------------------------------------------------------------------
# Pure-JAX reference (correctness check only)
# -----------------------------------------------------------------------------
def gru_model_ref(x, params):
    h_seq = jnp.transpose(x.astype(jnp.float32), (1, 0, 2))   # (T, B, I)
    T = h_seq.shape[0]
    for lp in params["layers"]:
        H = lp["whh"].shape[0]
        h = jnp.zeros((h_seq.shape[1], H), jnp.float32)
        outs = []
        for t in range(T):
            xt = h_seq[t]
            gi = xt @ lp["wih"] + lp["bih"]
            gh = h @ lp["whh"] + lp["bhh"]
            r = jax.nn.sigmoid(gi[:, :H] + gh[:, :H])
            z = jax.nn.sigmoid(gi[:, H:2 * H] + gh[:, H:2 * H])
            n = jnp.tanh(gi[:, 2 * H:] + r * gh[:, 2 * H:])
            h = (1.0 - z) * n + z * h
            outs.append(h)
        h_seq = jnp.stack(outs, axis=0)
    return h_seq[-1] @ params["fc_w_t"] + params["fc_b"]


if __name__ == "__main__":
    B, T, INPUT, HIDDEN, LAYERS, OUTPUT = 2, 8, 16, 32, 2, 4

    key = jax.random.PRNGKey(0)
    k_params, k_x = jax.random.split(key)
    params = init_params(k_params, INPUT, HIDDEN, LAYERS, OUTPUT)
    x = jax.random.normal(k_x, (B, T, INPUT), jnp.float32)

    out = jax.block_until_ready(gru_model_forward(x, params))
    ref = gru_model_ref(x, params)

    assert out.shape == (B, OUTPUT)
    assert jnp.allclose(out, ref, atol=1e-4, rtol=1e-4), "mismatch vs reference"

    print("KERNEL_OK")
</pallas_src>

<mosaic_0001>
module attributes {stable_mosaic.version = 11 : i64} {
  func.func @_gru_model_kernel(%arg0: memref<8x8x16xf32, #tpu.memory_space<vmem>>, %arg1: memref<16x96xf32, #tpu.memory_space<vmem>>, %arg2: memref<32x96xf32, #tpu.memory_space<vmem>>, %arg3: memref<1x96xf32, #tpu.memory_space<vmem>>, %arg4: memref<1x96xf32, #tpu.memory_space<vmem>>, %arg5: memref<32x96xf32, #tpu.memory_space<vmem>>, %arg6: memref<32x96xf32, #tpu.memory_space<vmem>>, %arg7: memref<1x96xf32, #tpu.memory_space<vmem>>, %arg8: memref<1x96xf32, #tpu.memory_space<vmem>>, %arg9: memref<32x4xf32, #tpu.memory_space<vmem>>, %arg10: memref<1x4xf32, #tpu.memory_space<vmem>>, %arg11: memref<8x4xf32, #tpu.memory_space<vmem>>, %arg12: memref<8x8x32xf32, #tpu.memory_space<vmem>>) attributes {dimension_semantics = [], scalar_prefetch = 0 : i64, scratch_operands = 1 : i64, tpu.core_type = #tpu.core_type<tc>} {
    %cst = arith.constant 0.000000e+00 : f32
    %0 = vector.broadcast %cst : f32 to vector<8x32xf32>
    %c0_i32 = arith.constant 0 : i32
    %1 = arith.index_cast %c0_i32 : i32 to index
    %c0 = arith.constant 0 : index
    %c0_0 = arith.constant 0 : index
    %2 = vector.load %arg0[%1, %c0, %c0_0] : memref<8x8x16xf32, #tpu.memory_space<vmem>>, vector<1x8x16xf32>
    %3 = vector.shape_cast %2 : vector<1x8x16xf32> to vector<8x16xf32>
    %c0_1 = arith.constant 0 : index
    %c0_2 = arith.constant 0 : index
    %4 = vector.load %arg1[%c0_1, %c0_2] : memref<16x96xf32, #tpu.memory_space<vmem>>, vector<16x96xf32>
    %cst_3 = arith.constant dense<0.000000e+00> : vector<8x96xf32>
    %5 = tpu.matmul %3, %4, %cst_3 {dimension_numbers = #tpu.dot_dimension_numbers<[1], [0], [0], [1], [0, 0, 1, 1], [], []>} : vector<8x16xf32>, vector<16x96xf32>, vector<8x96xf32> -> vector<8x96xf32>
    %c0_4 = arith.constant 0 : index
    %c0_5 = arith.constant 0 : index
    %6 = vector.load %arg3[%c0_4, %c0_5] : memref<1x96xf32, #tpu.memory_space<vmem>>, vector<1x96xf32>
    %7 = vector.broadcast %6 : vector<1x96xf32> to vector<8x96xf32>
    %8 = arith.addf %5, %7 : vector<8x96xf32>
    %c0_6 = arith.constant 0 : index
    %c0_7 = arith.constant 0 : index
    %9 = vector.load %arg2[%c0_6, %c0_7] : memref<32x96xf32, #tpu.memory_space<vmem>>, vector<32x96xf32>
    %cst_8 = arith.constant dense<0.000000e+00> : vector<8x96xf32>
    %10 = tpu.matmul %0, %9, %cst_8 {dimension_numbers = #tpu.dot_dimension_numbers<[1], [0], [0], [1], [0, 0, 1, 1], [], []>} : vector<8x32xf32>, vector<32x96xf32>, vector<8x96xf32> -> vector<8x96xf32>
    %c0_9 = arith.constant 0 : index
    %c0_10 = arith.constant 0 : index
    %11 = vector.load %arg4[%c0_9, %c0_10] : memref<1x96xf32, #tpu.memory_space<vmem>>, vector<1x96xf32>
    %12 = vector.broadcast %11 : vector<1x96xf32> to vector<8x96xf32>
    %13 = arith.addf %10, %12 : vector<8x96xf32>
    %14 = vector.extract_strided_slice %8 {offsets = [0, 0], sizes = [8, 32], strides = [1, 1]} : vector<8x96xf32> to vector<8x32xf32>
    %15 = vector.extract_strided_slice %13 {offsets = [0, 0], sizes = [8, 32], strides = [1, 1]} : vector<8x96xf32> to vector<8x32xf32>
    %16 = arith.addf %14, %15 : vector<8x32xf32>
    %17 = arith.negf %16 : vector<8x32xf32>
    %18 = math.exp %17 : vector<8x32xf32>
    %cst_11 = arith.constant 1.000000e+00 : f32
    %19 = vector.broadcast %cst_11 : f32 to vector<8x32xf32>
    %20 = arith.addf %19, %18 : vector<8x32xf32>
    %21 = arith.divf %19, %20 : vector<8x32xf32>
    %22 = vector.extract_strided_slice %8 {offsets = [0, 32], sizes = [8, 32], strides = [1, 1]} : vector<8x96xf32> to vector<8x32xf32>
    %23 = vector.extract_strided_slice %13 {offsets = [0, 32], sizes = [8, 32], strides = [1, 1]} : vector<8x96xf32> to vector<8x32xf32>
    %24 = arith.addf %22, %23 : vector<8x32xf32>
    %25 = arith.negf %24 : vector<8x32xf32>
    %26 = math.exp %25 : vector<8x32xf32>
    %cst_12 = arith.constant 1.000000e+00 : f32
    %27 = vector.broadcast %cst_12 : f32 to vector<8x32xf32>
    %28 = arith.addf %27, %26 : vector<8x32xf32>
    %29 = arith.divf %27, %28 : vector<8x32xf32>
    %30 = vector.extract_strided_slice %8 {offsets = [0, 64], sizes = [8, 32], strides = [1, 1]} : vector<8x96xf32> to vector<8x32xf32>
    %31 = vector.extract_strided_slice %13 {offsets = [0, 64], sizes = [8, 32], strides = [1, 1]} : vector<8x96xf32> to vector<8x32xf32>
    %32 = arith.mulf %21, %31 : vector<8x32xf32>
    %33 = arith.addf %30, %32 : vector<8x32xf32>
    %34 = math.tanh %33 : vector<8x32xf32>
    %cst_13 = arith.constant 1.000000e+00 : f32
    %35 = vector.broadcast %cst_13 : f32 to vector<8x32xf32>
    %36 = arith.subf %35, %29 : vector<8x32xf32>
    %37 = arith.mulf %36, %34 : vector<8x32xf32>
    %38 = arith.mulf %29, %0 : vector<8x32xf32>
    %39 = arith.addf %37, %38 : vector<8x32xf32>
    %40 = arith.index_cast %c0_i32 : i32 to index
    %c0_14 = arith.constant 0 : index
    %c0_15 = arith.constant 0 : index
    %41 = vector.load %arg12[%40, %c0_14, %c0_15] : memref<8x8x32xf32, #tpu.memory_space<vmem>>, vector<1x8x32xf32>
    %42 = vector.shape_cast %41 : vector<1x8x32xf32> to vector<8x32xf32>
    %43 = vector.shape_cast %39 : vector<8x32xf32> to vector<1x8x32xf32>
    tpu.vector_store %arg12[%40, %c0_14, %c0_15], %43 {strides = array<i32>} : memref<8x8x32xf32, #tpu.memory_space<vmem>>, vector<1x8x32xf32>,
    %c1_i32 = arith.constant 1 : i32
    %44 = arith.index_cast %c1_i32 : i32 to index
    %c0_16 = arith.constant 0 : index
    %c0_17 = arith.constant 0 : index
    %45 = vector.load %arg0[%44, %c0_16, %c0_17] : memref<8x8x16xf32, #tpu.memory_space<vmem>>, vector<1x8x16xf32>
    %46 = vector.shape_cast %45 : vector<1x8x16xf32> to vector<8x16xf32>
    %c0_18 = arith.constant 0 : index
    %c0_19 = arith.constant 0 : index
    %47 = vector.load %arg1[%c0_18, %c0_19] : memref<16x96xf32, #tpu.memory_space<vmem>>, vector<16x96xf32>
    %cst_20 = arith.constant dense<0.000000e+00> : vector<8x96xf32>
    %48 = tpu.matmul %46, %47, %cst_20 {dimension_numbers = #tpu.dot_dimension_numbers<[1], [0], [0], [1], [0, 0, 1, 1], [], []>} : vector<8x16xf32>, vector<16x96xf32>, vector<8x96xf32> -> vector<8x96xf32>
    %c0_21 = arith.constant 0 : index
    %c0_22 = arith.constant 0 : index
    %49 = vector.load %arg3[%c0_21, %c0_22] : memref<1x96xf32, #tpu.memory_space<vmem>>, vector<1x96xf32>
    %50 = vector.broadcast %49 : vector<1x96xf32> to vector<8x96xf32>
    %51 = arith.addf %48, %50 : vector<8x96xf32>
    %c0_23 = arith.constant 0 : index
    %c0_24 = arith.constant 0 : index
    %52 = vector.load %arg2[%c0_23, %c0_24] : memref<32x96xf32, #tpu.memory_space<vmem>>, vector<32x96xf32>
    %cst_25 = arith.constant dense<0.000000e+00> : vector<8x96xf32>
    %53 = tpu.matmul %39, %52, %cst_25 {dimension_numbers = #tpu.dot_dimension_numbers<[1], [0], [0], [1], [0, 0, 1, 1], [], []>} : vector<8x32xf32>, vector<32x96xf32>, vector<8x96xf32> -> vector<8x96xf32>
    %c0_26 = arith.constant 0 : index
    %c0_27 = arith.constant 0 : index
    %54 = vector.load %arg4[%c0_26, %c0_27] : memref<1x96xf32, #tpu.memory_space<vmem>>, vector<1x96xf32>
    %55 = vector.broadcast %54 : vector<1x96xf32> to vector<8x96xf32>
    %56 = arith.addf %53, %55 : vector<8x96xf32>
    %57 = vector.extract_strided_slice %51 {offsets = [0, 0], sizes = [8, 32], strides = [1, 1]} : vector<8x96xf32> to vector<8x32xf32>
    %58 = vector.extract_strided_slice %56 {offsets = [0, 0], sizes = [8, 32], strides = [1, 1]} : vector<8x96xf32> to vector<8x32xf32>
    %59 = arith.addf %57, %58 : vector<8x32xf32>
    %60 = arith.negf %59 : vector<8x32xf32>
    %61 = math.exp %60 : vector<8x32xf32>
    %cst_28 = arith.constant 1.000000e+00 : f32
    %62 = vector.broadcast %cst_28 : f32 to vector<8x32xf32>
    %63 = arith.addf %62, %61 : vector<8x32xf32>
    %64 = arith.divf %62, %63 : vector<8x32xf32>
    %65 = vector.extract_strided_slice %51 {offsets = [0, 32], sizes = [8, 32], strides = [1, 1]} : vector<8x96xf32> to vector<8x32xf32>
    %66 = vector.extract_strided_slice %56 {offsets = [0, 32], sizes = [8, 32], strides = [1, 1]} : vector<8x96xf32> to vector<8x32xf32>
    %67 = arith.addf %65, %66 : vector<8x32xf32>
    %68 = arith.negf %67 : vector<8x32xf32>
    %69 = math.exp %68 : vector<8x32xf32>
    %cst_29 = arith.constant 1.000000e+00 : f32
    %70 = vector.broadcast %cst_29 : f32 to vector<8x32xf32>
    %71 = arith.addf %70, %69 : vector<8x32xf32>
    %72 = arith.divf %70, %71 : vector<8x32xf32>
    %73 = vector.extract_strided_slice %51 {offsets = [0, 64], sizes = [8, 32], strides = [1, 1]} : vector<8x96xf32> to vector<8x32xf32>
    %74 = vector.extract_strided_slice %56 {offsets = [0, 64], sizes = [8, 32], strides = [1, 1]} : vector<8x96xf32> to vector<8x32xf32>
    %75 = arith.mulf %64, %74 : vector<8x32xf32>
    %76 = arith.addf %73, %75 : vector<8x32xf32>
    %77 = math.tanh %76 : vector<8x32xf32>
    %cst_30 = arith.constant 1.000000e+00 : f32
    %78 = vector.broadcast %cst_30 : f32 to vector<8x32xf32>
    %79 = arith.subf %78, %72 : vector<8x32xf32>
    %80 = arith.mulf %79, %77 : vector<8x32xf32>
    %81 = arith.mulf %72, %39 : vector<8x32xf32>
    %82 = arith.addf %80, %81 : vector<8x32xf32>
    %83 = arith.index_cast %c1_i32 : i32 to index
    %c0_31 = arith.constant 0 : index
    %c0_32 = arith.constant 0 : index
    %84 = vector.load %arg12[%83, %c0_31, %c0_32] : memref<8x8x32xf32, #tpu.memory_space<vmem>>, vector<1x8x32xf32>
    %85 = vector.shape_cast %84 : vector<1x8x32xf32> to vector<8x32xf32>
    %86 = vector.shape_cast %82 : vector<8x32xf32> to vector<1x8x32xf32>
    tpu.vector_store %arg12[%83, %c0_31, %c0_32], %86 {strides = array<i32>} : memref<8x8x32xf32, #tpu.memory_space<vmem>>, vector<1x8x32xf32>,
    %c2_i32 = arith.constant 2 : i32
    %87 = arith.index_cast %c2_i32 : i32 to index
    %c0_33 = arith.constant 0 : index
    %c0_34 = arith.constant 0 : index
    %88 = vector.load %arg0[%87, %c0_33, %c0_34] : memref<8x8x16xf32, #tpu.memory_space<vmem>>, vector<1x8x16xf32>
    %89 = vector.shape_cast %88 : vector<1x8x16xf32> to vector<8x16xf32>
    %c0_35 = arith.constant 0 : index
    %c0_36 = arith.constant 0 : index
    %90 = vector.load %arg1[%c0_35, %c0_36] : memref<16x96xf32, #tpu.memory_space<vmem>>, vector<16x96xf32>
    %cst_37 = arith.constant dense<0.000000e+00> : vector<8x96xf32>
    %91 = tpu.matmul %89, %90, %cst_37 {dimension_numbers = #tpu.dot_dimension_numbers<[1], [0], [0], [1], [0, 0, 1, 1], [], []>} : vector<8x16xf32>, vector<16x96xf32>, vector<8x96xf32> -> vector<8x96xf32>
    %c0_38 = arith.constant 0 : index
    %c0_39 = arith.constant 0 : index
    %92 = vector.load %arg3[%c0_38, %c0_39] : memref<1x96xf32, #tpu.memory_space<vmem>>, vector<1x96xf32>
    %93 = vector.broadcast %92 : vector<1x96xf32> to vector<8x96xf32>
    %94 = arith.addf %91, %93 : vector<8x96xf32>
    %c0_40 = arith.constant 0 : index
    %c0_41 = arith.constant 0 : index
    %95 = vector.load %arg2[%c0_40, %c0_41] : memref<32x96xf32, #tpu.memory_space<vmem>>, vector<32x96xf32>
    %cst_42 = arith.constant dense<0.000000e+00> : vector<8x96xf32>
    %96 = tpu.matmul %82, %95, %cst_42 {dimension_numbers = #tpu.dot_dimension_numbers<[1], [0], [0], [1], [0, 0, 1, 1], [], []>} : vector<8x32xf32>, vector<32x96xf32>, vector<8x96xf32> -> vector<8x96xf32>
    %c0_43 = arith.constant 0 : index
    %c0_44 = arith.constant 0 : index
    %97 = vector.load %arg4[%c0_43, %c0_44] : memref<1x96xf32, #tpu.memory_space<vmem>>, vector<1x96xf32>
    %98 = vector.broadcast %97 : vector<1x96xf32> to vector<8x96xf32>
    %99 = arith.addf %96, %98 : vector<8x96xf32>
    %100 = vector.extract_strided_slice %94 {offsets = [0, 0], sizes = [8, 32], strides = [1, 1]} : vector<8x96xf32> to vector<8x32xf32>
    %101 = vector.extract_strided_slice %99 {offsets = [0, 0], sizes = [8, 32], strides = [1, 1]} : vector<8x96xf32> to vector<8x32xf32>
    %102 = arith.addf %100, %101 : vector<8x32xf32>
    %103 = arith.negf %102 : vector<8x32xf32>
    %104 = math.exp %103 : vector<8x32xf32>
    %cst_45 = arith.constant 1.000000e+00 : f32
    %105 = vector.broadcast %cst_45 : f32 to vector<8x32xf32>
    %106 = arith.addf %105, %104 : vector<8x32xf32>
    %107 = arith.divf %105, %106 : vector<8x32xf32>
    %108 = vector.extract_strided_slice %94 {offsets = [0, 32], sizes = [8, 32], strides = [1, 1]} : vector<8x96xf32> to vector<8x32xf32>
    %109 = vector.extract_strided_slice %99 {offsets = [0, 32], sizes = [8, 32], strides = [1, 1]} : vector<8x96xf32> to vector<8x32xf32>
    %110 = arith.addf %108, %109 : vector<8x32xf32>
    %111 = arith.negf %110 : vector<8x32xf32>
    %112 = math.exp %111 : vector<8x32xf32>
    %cst_46 = arith.constant 1.000000e+00 : f32
    %113 = vector.broadcast %cst_46 : f32 to vector<8x32xf32>
    %114 = arith.addf %113, %112 : vector<8x32xf32>
    %115 = arith.divf %113, %114 : vector<8x32xf32>
    %116 = vector.extract_strided_slice %94 {offsets = [0, 64], sizes = [8, 32], strides = [1, 1]} : vector<8x96xf32> to vector<8x32xf32>
    %117 = vector.extract_strided_slice %99 {offsets = [0, 64], sizes = [8, 32], strides = [1, 1]} : vector<8x96xf32> to vector<8x32xf32>
    %118 = arith.mulf %107, %117 : vector<8x32xf32>
    %119 = arith.addf %116, %118 : vector<8x32xf32>
    %120 = math.tanh %119 : vector<8x32xf32>
    %cst_47 = arith.constant 1.000000e+00 : f32
    %121 = vector.broadcast %cst_47 : f32 to vector<8x32xf32>
    %122 = arith.subf %121, %115 : vector<8x32xf32>
    %123 = arith.mulf %122, %120 : vector<8x32xf32>
    %124 = arith.mulf %115, %82 : vector<8x32xf32>
    %125 = arith.addf %123, %124 : vector<8x32xf32>
    %126 = arith.index_cast %c2_i32 : i32 to index
    %c0_48 = arith.constant 0 : index
    %c0_49 = arith.constant 0 : index
    %127 = vector.load %arg12[%126, %c0_48, %c0_49] : memref<8x8x32xf32, #tpu.memory_space<vmem>>, vector<1x8x32xf32>
    %128 = vector.shape_cast %127 : vector<1x8x32xf32> to vector<8x32xf32>
    %129 = vector.shape_cast %125 : vector<8x32xf32> to vector<1x8x32xf32>
    tpu.vector_store %arg12[%126, %c0_48, %c0_49], %129 {strides = array<i32>} : memref<8x8x32xf32, #tpu.memory_space<vmem>>, vector<1x8x32xf32>,
    %c3_i32 = arith.constant 3 : i32
    %130 = arith.index_cast %c3_i32 : i32 to index
    %c0_50 = arith.constant 0 : index
    %c0_51 = arith.constant 0 : index
    %131 = vector.load %arg0[%130, %c0_50, %c0_51] : memref<8x8x16xf32, #tpu.memory_space<vmem>>, vector<1x8x16xf32>
    %132 = vector.shape_cast %131 : vector<1x8x16xf32> to vector<8x16xf32>
    %c0_52 = arith.constant 0 : index
    %c0_53 = arith.constant 0 : index
    %133 = vector.load %arg1[%c0_52, %c0_53] : memref<16x96xf32, #tpu.memory_space<vmem>>, vector<16x96xf32>
    %cst_54 = arith.constant dense<0.000000e+00> : vector<8x96xf32>
    %134 = tpu.matmul %132, %133, %cst_54 {dimension_numbers = #tpu.dot_dimension_numbers<[1], [0], [0], [1], [0, 0, 1, 1], [], []>} : vector<8x16xf32>, vector<16x96xf32>, vector<8x96xf32> -> vector<8x96xf32>
    %c0_55 = arith.constant 0 : index
    %c0_56 = arith.constant 0 : index
    %135 = vector.load %arg3[%c0_55, %c0_56] : memref<1x96xf32, #tpu.memory_space<vmem>>, vector<1x96xf32>
    %136 = vector.broadcast %135 : vector<1x96xf32> to vector<8x96xf32>
    %137 = arith.addf %134, %136 : vector<8x96xf32>
    %c0_57 = arith.constant 0 : index
    %c0_58 = arith.constant 0 : index
    %138 = vector.load %arg2[%c0_57, %c0_58] : memref<32x96xf32, #tpu.memory_space<vmem>>, vector<32x96xf32>
    %cst_59 = arith.constant dense<0.000000e+00> : vector<8x96xf32>
    %139 = tpu.matmul %125, %138, %cst_59 {dimension_numbers = #tpu.dot_dimension_numbers<[1], [0], [0], [1], [0, 0, 1, 1], [], []>} : vector<8x32xf32>, vector<32x96xf32>, vector<8x96xf32> -> vector<8x96xf32>
    %c0_60 = arith.constant 0 : index
    %c0_61 = arith.constant 0 : index
    %140 = vector.load %arg4[%c0_60, %c0_61] : memref<1x96xf32, #tpu.memory_space<vmem>>, vector<1x96xf32>
    %141 = vector.broadcast %140 : vector<1x96xf32> to vector<8x96xf32>
    %142 = arith.addf %139, %141 : vector<8x96xf32>
    %143 = vector.extract_strided_slice %137 {offsets = [0, 0], sizes = [8, 32], strides = [1, 1]} : vector<8x96xf32> to vector<8x32xf32>
    %144 = vector.extract_strided_slice %142 {offsets = [0, 0], sizes = [8, 32], strides = [1, 1]} : vector<8x96xf32> to vector<8x32xf32>
    %145 = arith.addf %143, %144 : vector<8x32xf32>
    %146 = arith.negf %145 : vector<8x32xf32>
    %147 = math.exp %146 : vector<8x32xf32>
    %cst_62 = arith.constant 1.000000e+00 : f32
    %148 = vector.broadcast %cst_62 : f32 to vector<8x32xf32>
    %149 = arith.addf %148, %147 : vector<8x32xf32>
    %150 = arith.divf %148, %149 : vector<8x32xf32>
    %151 = vector.extract_strided_slice %137 {offsets = [0, 32], sizes = [8, 32], strides = [1, 1]} : vector<8x96xf32> to vector<8x32xf32>
    %152 = vector.extract_strided_slice %142 {offsets = [0, 32], sizes = [8, 32], strides = [1, 1]} : vector<8x96xf32> to vector<8x32xf32>
    %153 = arith.addf %151, %152 : vector<8x32xf32>
    %154 = arith.negf %153 : vector<8x32xf32>
    %155 = math.exp %154 : vector<8x32xf32>
    %cst_63 = arith.constant 1.000000e+00 : f32
    %156 = vector.broadcast %cst_63 : f32 to vector<8x32xf32>
    %157 = arith.addf %156, %155 : vector<8x32xf32>
    %158 = arith.divf %156, %157 : vector<8x32xf32>
    %159 = vector.extract_strided_slice %137 {offsets = [0, 64], sizes = [8, 32], strides = [1, 1]} : vector<8x96xf32> to vector<8x32xf32>
    %160 = vector.extract_strided_slice %142 {offsets = [0, 64], sizes = [8, 32], strides = [1, 1]} : vector<8x96xf32> to vector<8x32xf32>
    %161 = arith.mulf %150, %160 : vector<8x32xf32>
    %162 = arith.addf %159, %161 : vector<8x32xf32>
    %163 = math.tanh %162 : vector<8x32xf32>
    %cst_64 = arith.constant 1.000000e+00 : f32
    %164 = vector.broadcast %cst_64 : f32 to vector<8x32xf32>
    %165 = arith.subf %164, %158 : vector<8x32xf32>
    %166 = arith.mulf %165, %163 : vector<8x32xf32>
    %167 = arith.mulf %158, %125 : vector<8x32xf32>
    %168 = arith.addf %166, %167 : vector<8x32xf32>
    %169 = arith.index_cast %c3_i32 : i32 to index
    %c0_65 = arith.constant 0 : index
    %c0_66 = arith.constant 0 : index
    %170 = vector.load %arg12[%169, %c0_65, %c0_66] : memref<8x8x32xf32, #tpu.memory_space<vmem>>, vector<1x8x32xf32>
    %171 = vector.shape_cast %170 : vector<1x8x32xf32> to vector<8x32xf32>
    %172 = vector.shape_cast %168 : vector<8x32xf32> to vector<1x8x32xf32>
    tpu.vector_store %arg12[%169, %c0_65, %c0_66], %172 {strides = array<i32>} : memref<8x8x32xf32, #tpu.memory_space<vmem>>, vector<1x8x32xf32>,
    %c4_i32 = arith.constant 4 : i32
    %173 = arith.index_cast %c4_i32 : i32 to index
    %c0_67 = arith.constant 0 : index
    %c0_68 = arith.constant 0 : index
    %174 = vector.load %arg0[%173, %c0_67, %c0_68] : memref<8x8x16xf32, #tpu.memory_space<vmem>>, vector<1x8x16xf32>
    %175 = vector.shape_cast %174 : vector<1x8x16xf32> to vector<8x16xf32>
    %c0_69 = arith.constant 0 : index
    %c0_70 = arith.constant 0 : index
    %176 = vector.load %arg1[%c0_69, %c0_70] : memref<16x96xf32, #tpu.memory_space<vmem>>, vector<16x96xf32>
    %cst_71 = arith.constant dense<0.000000e+00> : vector<8x96xf32>
    %177 = tpu.matmul %175, %176, %cst_71 {dimension_numbers = #tpu.dot_dimension_numbers<[1], [0], [0], [1], [0, 0, 1, 1], [], []>} : vector<8x16xf32>, vector<16x96xf32>, vector<8x96xf32> -> vector<8x96xf32>
    %c0_72 = arith.constant 0 : index
    %c0_73 = arith.constant 0 : index
    %178 = vector.load %arg3[%c0_72, %c0_73] : memref<1x96xf32, #tpu.memory_space<vmem>>, vector<1x96xf32>
    %179 = vector.broadcast %178 : vector<1x96xf32> to vector<8x96xf32>
    %180 = arith.addf %177, %179 : vector<8x96xf32>
    %c0_74 = arith.constant 0 : index
    %c0_75 = arith.constant 0 : index
    %181 = vector.load %arg2[%c0_74, %c0_75] : memref<32x96xf32, #tpu.memory_space<vmem>>, vector<32x96xf32>
    %cst_76 = arith.constant dense<0.000000e+00> : vector<8x96xf32>
    %182 = tpu.matmul %168, %181, %cst_76 {dimension_numbers = #tpu.dot_dimension_numbers<[1], [0], [0], [1], [0, 0, 1, 1], [], []>} : vector<8x32xf32>, vector<32x96xf32>, vector<8x96xf32> -> vector<8x96xf32>
    %c0_77 = arith.constant 0 : index
    %c0_78 = arith.constant 0 : index
    %183 = vector.load %arg4[%c0_77, %c0_78] : memref<1x96xf32, #tpu.memory_space<vmem>>, vector<1x96xf32>
    %184 = vector.broadcast %183 : vector<1x96xf32> to vector<8x96xf32>
    %185 = arith.addf %182, %184 : vector<8x96xf32>
    %186 = vector.extract_strided_slice %180 {offsets = [0, 0], sizes = [8, 32], strides = [1, 1]} : vector<8x96xf32> to vector<8x32xf32>
    %187 = vector.extract_strided_slice %185 {offsets = [0, 0], sizes = [8, 32], strides = [1, 1]} : vector<8x96xf32> to vector<8x32xf32>
    %188 = arith.addf %186, %187 : vector<8x32xf32>
    %189 = arith.negf %188 : vector<8x32xf32>
    %190 = math.exp %189 : vector<8x32xf32>
    %cst_79 = arith.constant 1.000000e+00 : f32
    %191 = vector.broadcast %cst_79 : f32 to vector<8x32xf32>
    %192 = arith.addf %191, %190 : vector<8x32xf32>
    %193 = arith.divf %191, %192 : vector<8x32xf32>
    %194 = vector.extract_strided_slice %180 {offsets = [0, 32], sizes = [8, 32], strides = [1, 1]} : vector<8x96xf32> to vector<8x32xf32>
    %195 = vector.extract_strided_slice %185 {offsets = [0, 32], sizes = [8, 32], strides = [1, 1]} : vector<8x96xf32> to vector<8x32xf32>
    %196 = arith.addf %194, %195 : vector<8x32xf32>
    %197 = arith.negf %196 : vector<8x32xf32>
    %198 = math.exp %197 : vector<8x32xf32>
    %cst_80 = arith.constant 1.000000e+00 : f32
    %199 = vector.broadcast %cst_80 : f32 to vector<8x32xf32>
    %200 = arith.addf %199, %198 : vector<8x32xf32>
    %201 = arith.divf %199, %200 : vector<8x32xf32>
    %202 = vector.extract_strided_slice %180 {offsets = [0, 64], sizes = [8, 32], strides = [1, 1]} : vector<8x96xf32> to vector<8x32xf32>
    %203 = vector.extract_strided_slice %185 {offsets = [0, 64], sizes = [8, 32], strides = [1, 1]} : vector<8x96xf32> to vector<8x32xf32>
    %204 = arith.mulf %193, %203 : vector<8x32xf32>
    %205 = arith.addf %202, %204 : vector<8x32xf32>
    %206 = math.tanh %205 : vector<8x32xf32>
    %cst_81 = arith.constant 1.000000e+00 : f32
    %207 = vector.broadcast %cst_81 : f32 to vector<8x32xf32>
    %208 = arith.subf %207, %201 : vector<8x32xf32>
    %209 = arith.mulf %208, %206 : vector<8x32xf32>
    %210 = arith.mulf %201, %168 : vector<8x32xf32>
    %211 = arith.addf %209, %210 : vector<8x32xf32>
    %212 = arith.index_cast %c4_i32 : i32 to index
    %c0_82 = arith.constant 0 : index
    %c0_83 = arith.constant 0 : index
    %213 = vector.load %arg12[%212, %c0_82, %c0_83] : memref<8x8x32xf32, #tpu.memory_space<vmem>>, vector<1x8x32xf32>
    %214 = vector.shape_cast %213 : vector<1x8x32xf32> to vector<8x32xf32>
    %215 = vector.shape_cast %211 : vector<8x32xf32> to vector<1x8x32xf32>
    tpu.vector_store %arg12[%212, %c0_82, %c0_83], %215 {strides = array<i32>} : memref<8x8x32xf32, #tpu.memory_space<vmem>>, vector<1x8x32xf32>,
    %c5_i32 = arith.constant 5 : i32
    %216 = arith.index_cast %c5_i32 : i32 to index
    %c0_84 = arith.constant 0 : index
    %c0_85 = arith.constant 0 : index
    %217 = vector.load %arg0[%216, %c0_84, %c0_85] : memref<8x8x16xf32, #tpu.memory_space<vmem>>, vector<1x8x16xf32>
    %218 = vector.shape_cast %217 : vector<1x8x16xf32> to vector<8x16xf32>
    %c0_86 = arith.constant 0 : index
    %c0_87 = arith.constant 0 : index
    %219 = vector.load %arg1[%c0_86, %c0_87] : memref<16x96xf32, #tpu.memory_space<vmem>>, vector<16x96xf32>
    %cst_88 = arith.constant dense<0.000000e+00> : vector<8x96xf32>
    %220 = tpu.matmul %218, %219, %cst_88 {dimension_numbers = #tpu.dot_dimension_numbers<[1], [0], [0], [1], [0, 0, 1, 1], [], []>} : vector<8x16xf32>, vector<16x96xf32>, vector<8x96xf32> -> vector<8x96xf32>
    %c0_89 = arith.constant 0 : index
    %c0_90 = arith.constant 0 : index
    %221 = vector.load %arg3[%c0_89, %c0_90] : memref<1x96xf32, #tpu.memory_space<vmem>>, vector<1x96xf32>
    %222 = vector.broadcast %221 : vector<1x96xf32> to vector<8x96xf32>
    %223 = arith.addf %220, %222 : vector<8x96xf32>
    %c0_91 = arith.constant 0 : index
    %c0_92 = arith.constant 0 : index
    %224 = vector.load %arg2[%c0_91, %c0_92] : memref<32x96xf32, #tpu.memory_space<vmem>>, vector<32x96xf32>
    %cst_93 = arith.constant dense<0.000000e+00> : vector<8x96xf32>
    %225 = tpu.matmul %211, %224, %cst_93 {dimension_numbers = #tpu.dot_dimension_numbers<[1], [0], [0], [1], [0, 0, 1, 1], [], []>} : vector<8x32xf32>, vector<32x96xf32>, vector<8x96xf32> -> vector<8x96xf32>
    %c0_94 = arith.constant 0 : index
    %c0_95 = arith.constant 0 : index
    %226 = vector.load %arg4[%c0_94, %c0_95] : memref<1x96xf32, #tpu.memory_space<vmem>>, vector<1x96xf32>
    %227 = vector.broadcast %226 : vector<1x96xf32> to vector<8x96xf32>
    %228 = arith.addf %225, %227 : vector<8x96xf32>
    %229 = vector.extract_strided_slice %223 {offsets = [0, 0], sizes = [8, 32], strides = [1, 1]} : vector<8x96xf32> to vector<8x32xf32>
    %230 = vector.extract_strided_slice %228 {offsets = [0, 0], sizes = [8, 32], strides = [1, 1]} : vector<8x96xf32> to vector<8x32xf32>
    %231 = arith.addf %229, %230 : vector<8x32xf32>
    %232 = arith.negf %231 : vector<8x32xf32>
    %233 = math.exp %232 : vector<8x32xf32>
    %cst_96 = arith.constant 1.000000e+00 : f32
    %234 = vector.broadcast %cst_96 : f32 to vector<8x32xf32>
    %235 = arith.addf %234, %233 : vector<8x32xf32>
    %236 = arith.divf %234, %235 : vector<8x32xf32>
    %237 = vector.extract_strided_slice %223 {offsets = [0, 32], sizes = [8, 32], strides = [1, 1]} : vector<8x96xf32> to vector<8x32xf32>
    %238 = vector.extract_strided_slice %228 {offsets = [0, 32], sizes = [8, 32], strides = [1, 1]} : vector<8x96xf32> to vector<8x32xf32>
    %239 = arith.addf %237, %238 : vector<8x32xf32>
    %240 = arith.negf %239 : vector<8x32xf32>
    %241 = math.exp %240 : vector<8x32xf32>
    %cst_97 = arith.constant 1.000000e+00 : f32
    %242 = vector.broadcast %cst_97 : f32 to vector<8x32xf32>
    %243 = arith.addf %242, %241 : vector<8x32xf32>
    %244 = arith.divf %242, %243 : vector<8x32xf32>
    %245 = vector.extract_strided_slice %223 {offsets = [0, 64], sizes = [8, 32], strides = [1, 1]} : vector<8x96xf32> to vector<8x32xf32>
    %246 = vector.extract_strided_slice %228 {offsets = [0, 64], sizes = [8, 32], strides = [1, 1]} : vector<8x96xf32> to vector<8x32xf32>
    %247 = arith.mulf %236, %246 : vector<8x32xf32>
    %248 = arith.addf %245, %247 : vector<8x32xf32>
    %249 = math.tanh %248 : vector<8x32xf32>
    %cst_98 = arith.constant 1.000000e+00 : f32
    %250 = vector.broadcast %cst_98 : f32 to vector<8x32xf32>
    %251 = arith.subf %250, %244 : vector<8x32xf32>
    %252 = arith.mulf %251, %249 : vector<8x32xf32>
    %253 = arith.mulf %244, %211 : vector<8x32xf32>
    %254 = arith.addf %252, %253 : vector<8x32xf32>
    %255 = arith.index_cast %c5_i32 : i32 to index
    %c0_99 = arith.constant 0 : index
    %c0_100 = arith.constant 0 : index
    %256 = vector.load %arg12[%255, %c0_99, %c0_100] : memref<8x8x32xf32, #tpu.memory_space<vmem>>, vector<1x8x32xf32>
    %257 = vector.shape_cast %256 : vector<1x8x32xf32> to vector<8x32xf32>
    %258 = vector.shape_cast %254 : vector<8x32xf32> to vector<1x8x32xf32>
    tpu.vector_store %arg12[%255, %c0_99, %c0_100], %258 {strides = array<i32>} : memref<8x8x32xf32, #tpu.memory_space<vmem>>, vector<1x8x32xf32>,
    %c6_i32 = arith.constant 6 : i32
    %259 = arith.index_cast %c6_i32 : i32 to index
    %c0_101 = arith.constant 0 : index
    %c0_102 = arith.constant 0 : index
    %260 = vector.load %arg0[%259, %c0_101, %c0_102] : memref<8x8x16xf32, #tpu.memory_space<vmem>>, vector<1x8x16xf32>
    %261 = vector.shape_cast %260 : vector<1x8x16xf32> to vector<8x16xf32>
    %c0_103 = arith.constant 0 : index
    %c0_104 = arith.constant 0 : index
    %262 = vector.load %arg1[%c0_103, %c0_104] : memref<16x96xf32, #tpu.memory_space<vmem>>, vector<16x96xf32>
    %cst_105 = arith.constant dense<0.000000e+00> : vector<8x96xf32>
    %263 = tpu.matmul %261, %262, %cst_105 {dimension_numbers = #tpu.dot_dimension_numbers<[1], [0], [0], [1], [0, 0, 1, 1], [], []>} : vector<8x16xf32>, vector<16x96xf32>, vector<8x96xf32> -> vector<8x96xf32>
    %c0_106 = arith.constant 0 : index
    %c0_107 = arith.constant 0 : index
    %264 = vector.load %arg3[%c0_106, %c0_107] : memref<1x96xf32, #tpu.memory_space<vmem>>, vector<1x96xf32>
    %265 = vector.broadcast %264 : vector<1x96xf32> to vector<8x96xf32>
    %266 = arith.addf %263, %265 : vector<8x96xf32>
    %c0_108 = arith.constant 0 : index
    %c0_109 = arith.constant 0 : index
    %267 = vector.load %arg2[%c0_108, %c0_109] : memref<32x96xf32, #tpu.memory_space<vmem>>, vector<32x96xf32>
    %cst_110 = arith.constant dense<0.000000e+00> : vector<8x96xf32>
    %268 = tpu.matmul %254, %267, %cst_110 {dimension_numbers = #tpu.dot_dimension_numbers<[1], [0], [0], [1], [0, 0, 1, 1], [], []>} : vector<8x32xf32>, vector<32x96xf32>, vector<8x96xf32> -> vector<8x96xf32>
    %c0_111 = arith.constant 0 : index
    %c0_112 = arith.constant 0 : index
    %269 = vector.load %arg4[%c0_111, %c0_112] : memref<1x96xf32, #tpu.memory_space<vmem>>, vector<1x96xf32>
    %270 = vector.broadcast %269 : vector<1x96xf32> to vector<8x96xf32>
    %271 = arith.addf %268, %270 : vector<8x96xf32>
    %272 = vector.extract_strided_slice %266 {offsets = [0, 0], sizes = [8, 32], strides = [1, 1]} : vector<8x96xf32> to vector<8x32xf32>
    %273 = vector.extract_strided_slice %271 {offsets = [0, 0], sizes = [8, 32], strides = [1, 1]} : vector<8x96xf32> to vector<8x32xf32>
    %274 = arith.addf %272, %273 : vector<8x32xf32>
    %275 = arith.negf %274 : vector<8x32xf32>
    %276 = math.exp %275 : vector<8x32xf32>
    %cst_113 = arith.constant 1.000000e+00 : f32
    %277 = vector.broadcast %cst_113 : f32 to vector<8x32xf32>
    %278 = arith.addf %277, %276 : vector<8x32xf32>
    %279 = arith.divf %277, %278 : vector<8x32xf32>
    %280 = vector.extract_strided_slice %266 {offsets = [0, 32], sizes = [8, 32], strides = [1, 1]} : vector<8x96xf32> to vector<8x32xf32>
    %281 = vector.extract_strided_slice %271 {offsets = [0, 32], sizes = [8, 32], strides = [1, 1]} : vector<8x96xf32> to vector<8x32xf32>
    %282 = arith.addf %280, %281 : vector<8x32xf32>
    %283 = arith.negf %282 : vector<8x32xf32>
    %284 = math.exp %283 : vector<8x32xf32>
    %cst_114 = arith.constant 1.000000e+00 : f32
    %285 = vector.broadcast %cst_114 : f32 to vector<8x32xf32>
    %286 = arith.addf %285, %284 : vector<8x32xf32>
    %287 = arith.divf %285, %286 : vector<8x32xf32>
    %288 = vector.extract_strided_slice %266 {offsets = [0, 64], sizes = [8, 32], strides = [1, 1]} : vector<8x96xf32> to vector<8x32xf32>
    %289 = vector.extract_strided_slice %271 {offsets = [0, 64], sizes = [8, 32], strides = [1, 1]} : vector<8x96xf32> to vector<8x32xf32>
    %290 = arith.mulf %279, %289 : vector<8x32xf32>
    %291 = arith.addf %288, %290 : vector<8x32xf32>
    %292 = math.tanh %291 : vector<8x32xf32>
    %cst_115 = arith.constant 1.000000e+00 : f32
    %293 = vector.broadcast %cst_115 : f32 to vector<8x32xf32>
    %294 = arith.subf %293, %287 : vector<8x32xf32>
    %295 = arith.mulf %294, %292 : vector<8x32xf32>
    %296 = arith.mulf %287, %254 : vector<8x32xf32>
    %297 = arith.addf %295, %296 : vector<8x32xf32>
    %298 = arith.index_cast %c6_i32 : i32 to index
    %c0_116 = arith.constant 0 : index
    %c0_117 = arith.constant 0 : index
    %299 = vector.load %arg12[%298, %c0_116, %c0_117] : memref<8x8x32xf32, #tpu.memory_space<vmem>>, vector<1x8x32xf32>
    %300 = vector.shape_cast %299 : vector<1x8x32xf32> to vector<8x32xf32>
    %301 = vector.shape_cast %297 : vector<8x32xf32> to vector<1x8x32xf32>
    tpu.vector_store %arg12[%298, %c0_116, %c0_117], %301 {strides = array<i32>} : memref<8x8x32xf32, #tpu.memory_space<vmem>>, vector<1x8x32xf32>,
    %c7_i32 = arith.constant 7 : i32
    %302 = arith.index_cast %c7_i32 : i32 to index
    %c0_118 = arith.constant 0 : index
    %c0_119 = arith.constant 0 : index
    %303 = vector.load %arg0[%302, %c0_118, %c0_119] : memref<8x8x16xf32, #tpu.memory_space<vmem>>, vector<1x8x16xf32>
    %304 = vector.shape_cast %303 : vector<1x8x16xf32> to vector<8x16xf32>
    %c0_120 = arith.constant 0 : index
    %c0_121 = arith.constant 0 : index
    %305 = vector.load %arg1[%c0_120, %c0_121] : memref<16x96xf32, #tpu.memory_space<vmem>>, vector<16x96xf32>
    %cst_122 = arith.constant dense<0.000000e+00> : vector<8x96xf32>
    %306 = tpu.matmul %304, %305, %cst_122 {dimension_numbers = #tpu.dot_dimension_numbers<[1], [0], [0], [1], [0, 0, 1, 1], [], []>} : vector<8x16xf32>, vector<16x96xf32>, vector<8x96xf32> -> vector<8x96xf32>
    %c0_123 = arith.constant 0 : index
    %c0_124 = arith.constant 0 : index
    %307 = vector.load %arg3[%c0_123, %c0_124] : memref<1x96xf32, #tpu.memory_space<vmem>>, vector<1x96xf32>
    %308 = vector.broadcast %307 : vector<1x96xf32> to vector<8x96xf32>
    %309 = arith.addf %306, %308 : vector<8x96xf32>
    %c0_125 = arith.constant 0 : index
    %c0_126 = arith.constant 0 : index
    %310 = vector.load %arg2[%c0_125, %c0_126] : memref<32x96xf32, #tpu.memory_space<vmem>>, vector<32x96xf32>
    %cst_127 = arith.constant dense<0.000000e+00> : vector<8x96xf32>
    %311 = tpu.matmul %297, %310, %cst_127 {dimension_numbers = #tpu.dot_dimension_numbers<[1], [0], [0], [1], [0, 0, 1, 1], [], []>} : vector<8x32xf32>, vector<32x96xf32>, vector<8x96xf32> -> vector<8x96xf32>
    %c0_128 = arith.constant 0 : index
    %c0_129 = arith.constant 0 : index
    %312 = vector.load %arg4[%c0_128, %c0_129] : memref<1x96xf32, #tpu.memory_space<vmem>>, vector<1x96xf32>
    %313 = vector.broadcast %312 : vector<1x96xf32> to vector<8x96xf32>
    %314 = arith.addf %311, %313 : vector<8x96xf32>
    %315 = vector.extract_strided_slice %309 {offsets = [0, 0], sizes = [8, 32], strides = [1, 1]} : vector<8x96xf32> to vector<8x32xf32>
    %316 = vector.extract_strided_slice %314 {offsets = [0, 0], sizes = [8, 32], strides = [1, 1]} : vector<8x96xf32> to vector<8x32xf32>
    %317 = arith.addf %315, %316 : vector<8x32xf32>
    %318 = arith.negf %317 : vector<8x32xf32>
    %319 = math.exp %318 : vector<8x32xf32>
    %cst_130 = arith.constant 1.000000e+00 : f32
    %320 = vector.broadcast %cst_130 : f32 to vector<8x32xf32>
    %321 = arith.addf %320, %319 : vector<8x32xf32>
    %322 = arith.divf %320, %321 : vector<8x32xf32>
    %323 = vector.extract_strided_slice %309 {offsets = [0, 32], sizes = [8, 32], strides = [1, 1]} : vector<8x96xf32> to vector<8x32xf32>
    %324 = vector.extract_strided_slice %314 {offsets = [0, 32], sizes = [8, 32], strides = [1, 1]} : vector<8x96xf32> to vector<8x32xf32>
    %325 = arith.addf %323, %324 : vector<8x32xf32>
    %326 = arith.negf %325 : vector<8x32xf32>
    %327 = math.exp %326 : vector<8x32xf32>
    %cst_131 = arith.constant 1.000000e+00 : f32
    %328 = vector.broadcast %cst_131 : f32 to vector<8x32xf32>
    %329 = arith.addf %328, %327 : vector<8x32xf32>
    %330 = arith.divf %328, %329 : vector<8x32xf32>
    %331 = vector.extract_strided_slice %309 {offsets = [0, 64], sizes = [8, 32], strides = [1, 1]} : vector<8x96xf32> to vector<8x32xf32>
    %332 = vector.extract_strided_slice %314 {offsets = [0, 64], sizes = [8, 32], strides = [1, 1]} : vector<8x96xf32> to vector<8x32xf32>
    %333 = arith.mulf %322, %332 : vector<8x32xf32>
    %334 = arith.addf %331, %333 : vector<8x32xf32>
    %335 = math.tanh %334 : vector<8x32xf32>
    %cst_132 = arith.constant 1.000000e+00 : f32
    %336 = vector.broadcast %cst_132 : f32 to vector<8x32xf32>
    %337 = arith.subf %336, %330 : vector<8x32xf32>
    %338 = arith.mulf %337, %335 : vector<8x32xf32>
    %339 = arith.mulf %330, %297 : vector<8x32xf32>
    %340 = arith.addf %338, %339 : vector<8x32xf32>
    %341 = arith.index_cast %c7_i32 : i32 to index
    %c0_133 = arith.constant 0 : index
    %c0_134 = arith.constant 0 : index
    %342 = vector.load %arg12[%341, %c0_133, %c0_134] : memref<8x8x32xf32, #tpu.memory_space<vmem>>, vector<1x8x32xf32>
    %343 = vector.shape_cast %342 : vector<1x8x32xf32> to vector<8x32xf32>
    %344 = vector.shape_cast %340 : vector<8x32xf32> to vector<1x8x32xf32>
    tpu.vector_store %arg12[%341, %c0_133, %c0_134], %344 {strides = array<i32>} : memref<8x8x32xf32, #tpu.memory_space<vmem>>, vector<1x8x32xf32>,
    %c8_i32 = arith.constant 8 : i32
    %cst_135 = arith.constant 0.000000e+00 : f32
    %345 = vector.broadcast %cst_135 : f32 to vector<8x32xf32>
    %c0_i32_136 = arith.constant 0 : i32
    %346 = arith.index_cast %c0_i32_136 : i32 to index
    %c0_137 = arith.constant 0 : index
    %c0_138 = arith.constant 0 : index
    %347 = vector.load %arg12[%346, %c0_137, %c0_138] : memref<8x8x32xf32, #tpu.memory_space<vmem>>, vector<1x8x32xf32>
    %348 = vector.shape_cast %347 : vector<1x8x32xf32> to vector<8x32xf32>
    %c0_139 = arith.constant 0 : index
    %c0_140 = arith.constant 0 : index
    %349 = vector.load %arg5[%c0_139, %c0_140] : memref<32x96xf32, #tpu.memory_space<vmem>>, vector<32x96xf32>
    %cst_141 = arith.constant dense<0.000000e+00> : vector<8x96xf32>
    %350 = tpu.matmul %348, %349, %cst_141 {dimension_numbers = #tpu.dot_dimension_numbers<[1], [0], [0], [1], [0, 0, 1, 1], [], []>} : vector<8x32xf32>, vector<32x96xf32>, vector<8x96xf32> -> vector<8x96xf32>
    %c0_142 = arith.constant 0 : index
    %c0_143 = arith.constant 0 : index
    %351 = vector.load %arg7[%c0_142, %c0_143] : memref<1x96xf32, #tpu.memory_space<vmem>>, vector<1x96xf32>
    %352 = vector.broadcast %351 : vector<1x96xf32> to vector<8x96xf32>
    %353 = arith.addf %350, %352 : vector<8x96xf32>
    %c0_144 = arith.constant 0 : index
    %c0_145 = arith.constant 0 : index
    %354 = vector.load %arg6[%c0_144, %c0_145] : memref<32x96xf32, #tpu.memory_space<vmem>>, vector<32x96xf32>
    %cst_146 = arith.constant dense<0.000000e+00> : vector<8x96xf32>
    %355 = tpu.matmul %345, %354, %cst_146 {dimension_numbers = #tpu.dot_dimension_numbers<[1], [0], [0], [1], [0, 0, 1, 1], [], []>} : vector<8x32xf32>, vector<32x96xf32>, vector<8x96xf32> -> vector<8x96xf32>
    %c0_147 = arith.constant 0 : index
    %c0_148 = arith.constant 0 : index
    %356 = vector.load %arg8[%c0_147, %c0_148] : memref<1x96xf32, #tpu.memory_space<vmem>>, vector<1x96xf32>
    %357 = vector.broadcast %356 : vector<1x96xf32> to vector<8x96xf32>
    %358 = arith.addf %355, %357 : vector<8x96xf32>
    %359 = vector.extract_strided_slice %353 {offsets = [0, 0], sizes = [8, 32], strides = [1, 1]} : vector<8x96xf32> to vector<8x32xf32>
    %360 = vector.extract_strided_slice %358 {offsets = [0, 0], sizes = [8, 32], strides = [1, 1]} : vector<8x96xf32> to vector<8x32xf32>
    %361 = arith.addf %359, %360 : vector<8x32xf32>
    %362 = arith.negf %361 : vector<8x32xf32>
    %363 = math.exp %362 : vector<8x32xf32>
    %cst_149 = arith.constant 1.000000e+00 : f32
    %364 = vector.broadcast %cst_149 : f32 to vector<8x32xf32>
    %365 = arith.addf %364, %363 : vector<8x32xf32>
    %366 = arith.divf %364, %365 : vector<8x32xf32>
    %367 = vector.extract_strided_slice %353 {offsets = [0, 32], sizes = [8, 32], strides = [1, 1]} : vector<8x96xf32> to vector<8x32xf32>
    %368 = vector.extract_strided_slice %358 {offsets = [0, 32], sizes = [8, 32], strides = [1, 1]} : vector<8x96xf32> to vector<8x32xf32>
    %369 = arith.addf %367, %368 : vector<8x32xf32>
    %370 = arith.negf %369 : vector<8x32xf32>
    %371 = math.exp %370 : vector<8x32xf32>
    %cst_150 = arith.constant 1.000000e+00 : f32
    %372 = vector.broadcast %cst_150 : f32 to vector<8x32xf32>
    %373 = arith.addf %372, %371 : vector<8x32xf32>
    %374 = arith.divf %372, %373 : vector<8x32xf32>
    %375 = vector.extract_strided_slice %353 {offsets = [0, 64], sizes = [8, 32], strides = [1, 1]} : vector<8x96xf32> to vector<8x32xf32>
    %376 = vector.extract_strided_slice %358 {offsets = [0, 64], sizes = [8, 32], strides = [1, 1]} : vector<8x96xf32> to vector<8x32xf32>
    %377 = arith.mulf %366, %376 : vector<8x32xf32>
    %378 = arith.addf %375, %377 : vector<8x32xf32>
    %379 = math.tanh %378 : vector<8x32xf32>
    %cst_151 = arith.constant 1.000000e+00 : f32
    %380 = vector.broadcast %cst_151 : f32 to vector<8x32xf32>
    %381 = arith.subf %380, %374 : vector<8x32xf32>
    %382 = arith.mulf %381, %379 : vector<8x32xf32>
    %383 = arith.mulf %374, %345 : vector<8x32xf32>
    %384 = arith.addf %382, %383 : vector<8x32xf32>
    %c1_i32_152 = arith.constant 1 : i32
    %385 = arith.index_cast %c1_i32_152 : i32 to index
    %c0_153 = arith.constant 0 : index
    %c0_154 = arith.constant 0 : index
    %386 = vector.load %arg12[%385, %c0_153, %c0_154] : memref<8x8x32xf32, #tpu.memory_space<vmem>>, vector<1x8x32xf32>
    %387 = vector.shape_cast %386 : vector<1x8x32xf32> to vector<8x32xf32>
    %c0_155 = arith.constant 0 : index
    %c0_156 = arith.constant 0 : index
    %388 = vector.load %arg5[%c0_155, %c0_156] : memref<32x96xf32, #tpu.memory_space<vmem>>, vector<32x96xf32>
    %cst_157 = arith.constant dense<0.000000e+00> : vector<8x96xf32>
    %389 = tpu.matmul %387, %388, %cst_157 {dimension_numbers = #tpu.dot_dimension_numbers<[1], [0], [0], [1], [0, 0, 1, 1], [], []>} : vector<8x32xf32>, vector<32x96xf32>, vector<8x96xf32> -> vector<8x96xf32>
    %c0_158 = arith.constant 0 : index
    %c0_159 = arith.constant 0 : index
    %390 = vector.load %arg7[%c0_158, %c0_159] : memref<1x96xf32, #tpu.memory_space<vmem>>, vector<1x96xf32>
    %391 = vector.broadcast %390 : vector<1x96xf32> to vector<8x96xf32>
    %392 = arith.addf %389, %391 : vector<8x96xf32>
    %c0_160 = arith.constant 0 : index
    %c0_161 = arith.constant 0 : index
    %393 = vector.load %arg6[%c0_160, %c0_161] : memref<32x96xf32, #tpu.memory_space<vmem>>, vector<32x96xf32>
    %cst_162 = arith.constant dense<0.000000e+00> : vector<8x96xf32>
    %394 = tpu.matmul %384, %393, %cst_162 {dimension_numbers = #tpu.dot_dimension_numbers<[1], [0], [0], [1], [0, 0, 1, 1], [], []>} : vector<8x32xf32>, vector<32x96xf32>, vector<8x96xf32> -> vector<8x96xf32>
    %c0_163 = arith.constant 0 : index
    %c0_164 = arith.constant 0 : index
    %395 = vector.load %arg8[%c0_163, %c0_164] : memref<1x96xf32, #tpu.memory_space<vmem>>, vector<1x96xf32>
    %396 = vector.broadcast %395 : vector<1x96xf32> to vector<8x96xf32>
    %397 = arith.addf %394, %396 : vector<8x96xf32>
    %398 = vector.extract_strided_slice %392 {offsets = [0, 0], sizes = [8, 32], strides = [1, 1]} : vector<8x96xf32> to vector<8x32xf32>
    %399 = vector.extract_strided_slice %397 {offsets = [0, 0], sizes = [8, 32], strides = [1, 1]} : vector<8x96xf32> to vector<8x32xf32>
    %400 = arith.addf %398, %399 : vector<8x32xf32>
    %401 = arith.negf %400 : vector<8x32xf32>
    %402 = math.exp %401 : vector<8x32xf32>
    %cst_165 = arith.constant 1.000000e+00 : f32
    %403 = vector.broadcast %cst_165 : f32 to vector<8x32xf32>
    %404 = arith.addf %403, %402 : vector<8x32xf32>
    %405 = arith.divf %403, %404 : vector<8x32xf32>
    %406 = vector.extract_strided_slice %392 {offsets = [0, 32], sizes = [8, 32], strides = [1, 1]} : vector<8x96xf32> to vector<8x32xf32>
    %407 = vector.extract_strided_slice %397 {offsets = [0, 32], sizes = [8, 32], strides = [1, 1]} : vector<8x96xf32> to vector<8x32xf32>
    %408 = arith.addf %406, %407 : vector<8x32xf32>
    %409 = arith.negf %408 : vector<8x32xf32>
    %410 = math.exp %409 : vector<8x32xf32>
    %cst_166 = arith.constant 1.000000e+00 : f32
    %411 = vector.broadcast %cst_166 : f32 to vector<8x32xf32>
    %412 = arith.addf %411, %410 : vector<8x32xf32>
    %413 = arith.divf %411, %412 : vector<8x32xf32>
    %414 = vector.extract_strided_slice %392 {offsets = [0, 64], sizes = [8, 32], strides = [1, 1]} : vector<8x96xf32> to vector<8x32xf32>
    %415 = vector.extract_strided_slice %397 {offsets = [0, 64], sizes = [8, 32], strides = [1, 1]} : vector<8x96xf32> to vector<8x32xf32>
    %416 = arith.mulf %405, %415 : vector<8x32xf32>
    %417 = arith.addf %414, %416 : vector<8x32xf32>
    %418 = math.tanh %417 : vector<8x32xf32>
    %cst_167 = arith.constant 1.000000e+00 : f32
    %419 = vector.broadcast %cst_167 : f32 to vector<8x32xf32>
    %420 = arith.subf %419, %413 : vector<8x32xf32>
    %421 = arith.mulf %420, %418 : vector<8x32xf32>
    %422 = arith.mulf %413, %384 : vector<8x32xf32>
    %423 = arith.addf %421, %422 : vector<8x32xf32>
    %c2_i32_168 = arith.constant 2 : i32
    %424 = arith.index_cast %c2_i32_168 : i32 to index
    %c0_169 = arith.constant 0 : index
    %c0_170 = arith.constant 0 : index
    %425 = vector.load %arg12[%424, %c0_169, %c0_170] : memref<8x8x32xf32, #tpu.memory_space<vmem>>, vector<1x8x32xf32>
    %426 = vector.shape_cast %425 : vector<1x8x32xf32> to vector<8x32xf32>
    %c0_171 = arith.constant 0 : index
    %c0_172 = arith.constant 0 : index
    %427 = vector.load %arg5[%c0_171, %c0_172] : memref<32x96xf32, #tpu.memory_space<vmem>>, vector<32x96xf32>
    %cst_173 = arith.constant dense<0.000000e+00> : vector<8x96xf32>
    %428 = tpu.matmul %426, %427, %cst_173 {dimension_numbers = #tpu.dot_dimension_numbers<[1], [0], [0], [1], [0, 0, 1, 1], [], []>} : vector<8x32xf32>, vector<32x96xf32>, vector<8x96xf32> -> vector<8x96xf32>
    %c0_174 = arith.constant 0 : index
    %c0_175 = arith.constant 0 : index
    %429 = vector.load %arg7[%c0_174, %c0_175] : memref<1x96xf32, #tpu.memory_space<vmem>>, vector<1x96xf32>
    %430 = vector.broadcast %429 : vector<1x96xf32> to vector<8x96xf32>
    %431 = arith.addf %428, %430 : vector<8x96xf32>
    %c0_176 = arith.constant 0 : index
    %c0_177 = arith.constant 0 : index
    %432 = vector.load %arg6[%c0_176, %c0_177] : memref<32x96xf32, #tpu.memory_space<vmem>>, vector<32x96xf32>
    %cst_178 = arith.constant dense<0.000000e+00> : vector<8x96xf32>
    %433 = tpu.matmul %423, %432, %cst_178 {dimension_numbers = #tpu.dot_dimension_numbers<[1], [0], [0], [1], [0, 0, 1, 1], [], []>} : vector<8x32xf32>, vector<32x96xf32>, vector<8x96xf32> -> vector<8x96xf32>
    %c0_179 = arith.constant 0 : index
    %c0_180 = arith.constant 0 : index
    %434 = vector.load %arg8[%c0_179, %c0_180] : memref<1x96xf32, #tpu.memory_space<vmem>>, vector<1x96xf32>
    %435 = vector.broadcast %434 : vector<1x96xf32> to vector<8x96xf32>
    %436 = arith.addf %433, %435 : vector<8x96xf32>
    %437 = vector.extract_strided_slice %431 {offsets = [0, 0], sizes = [8, 32], strides = [1, 1]} : vector<8x96xf32> to vector<8x32xf32>
    %438 = vector.extract_strided_slice %436 {offsets = [0, 0], sizes = [8, 32], strides = [1, 1]} : vector<8x96xf32> to vector<8x32xf32>
    %439 = arith.addf %437, %438 : vector<8x32xf32>
    %440 = arith.negf %439 : vector<8x32xf32>
    %441 = math.exp %440 : vector<8x32xf32>
    %cst_181 = arith.constant 1.000000e+00 : f32
    %442 = vector.broadcast %cst_181 : f32 to vector<8x32xf32>
    %443 = arith.addf %442, %441 : vector<8x32xf32>
    %444 = arith.divf %442, %443 : vector<8x32xf32>
    %445 = vector.extract_strided_slice %431 {offsets = [0, 32], sizes = [8, 32], strides = [1, 1]} : vector<8x96xf32> to vector<8x32xf32>
    %446 = vector.extract_strided_slice %436 {offsets = [0, 32], sizes = [8, 32], strides = [1, 1]} : vector<8x96xf32> to vector<8x32xf32>
    %447 = arith.addf %445, %446 : vector<8x32xf32>
    %448 = arith.negf %447 : vector<8x32xf32>
    %449 = math.exp %448 : vector<8x32xf32>
    %cst_182 = arith.constant 1.000000e+00 : f32
    %450 = vector.broadcast %cst_182 : f32 to vector<8x32xf32>
    %451 = arith.addf %450, %449 : vector<8x32xf32>
    %452 = arith.divf %450, %451 : vector<8x32xf32>
    %453 = vector.extract_strided_slice %431 {offsets = [0, 64], sizes = [8, 32], strides = [1, 1]} : vector<8x96xf32> to vector<8x32xf32>
    %454 = vector.extract_strided_slice %436 {offsets = [0, 64], sizes = [8, 32], strides = [1, 1]} : vector<8x96xf32> to vector<8x32xf32>
    %455 = arith.mulf %444, %454 : vector<8x32xf32>
    %456 = arith.addf %453, %455 : vector<8x32xf32>
    %457 = math.tanh %456 : vector<8x32xf32>
    %cst_183 = arith.constant 1.000000e+00 : f32
    %458 = vector.broadcast %cst_183 : f32 to vector<8x32xf32>
    %459 = arith.subf %458, %452 : vector<8x32xf32>
    %460 = arith.mulf %459, %457 : vector<8x32xf32>
    %461 = arith.mulf %452, %423 : vector<8x32xf32>
    %462 = arith.addf %460, %461 : vector<8x32xf32>
    %c3_i32_184 = arith.constant 3 : i32
    %463 = arith.index_cast %c3_i32_184 : i32 to index
    %c0_185 = arith.constant 0 : index
    %c0_186 = arith.constant 0 : index
    %464 = vector.load %arg12[%463, %c0_185, %c0_186] : memref<8x8x32xf32, #tpu.memory_space<vmem>>, vector<1x8x32xf32>
    %465 = vector.shape_cast %464 : vector<1x8x32xf32> to vector<8x32xf32>
    %c0_187 = arith.constant 0 : index
    %c0_188 = arith.constant 0 : index
    %466 = vector.load %arg5[%c0_187, %c0_188] : memref<32x96xf32, #tpu.memory_space<vmem>>, vector<32x96xf32>
    %cst_189 = arith.constant dense<0.000000e+00> : vector<8x96xf32>
    %467 = tpu.matmul %465, %466, %cst_189 {dimension_numbers = #tpu.dot_dimension_numbers<[1], [0], [0], [1], [0, 0, 1, 1], [], []>} : vector<8x32xf32>, vector<32x96xf32>, vector<8x96xf32> -> vector<8x96xf32>
    %c0_190 = arith.constant 0 : index
    %c0_191 = arith.constant 0 : index
    %468 = vector.load %arg7[%c0_190, %c0_191] : memref<1x96xf32, #tpu.memory_space<vmem>>, vector<1x96xf32>
    %469 = vector.broadcast %468 : vector<1x96xf32> to vector<8x96xf32>
    %470 = arith.addf %467, %469 : vector<8x96xf32>
    %c0_192 = arith.constant 0 : index
    %c0_193 = arith.constant 0 : index
    %471 = vector.load %arg6[%c0_192, %c0_193] : memref<32x96xf32, #tpu.memory_space<vmem>>, vector<32x96xf32>
    %cst_194 = arith.constant dense<0.000000e+00> : vector<8x96xf32>
    %472 = tpu.matmul %462, %471, %cst_194 {dimension_numbers = #tpu.dot_dimension_numbers<[1], [0], [0], [1], [0, 0, 1, 1], [], []>} : vector<8x32xf32>, vector<32x96xf32>, vector<8x96xf32> -> vector<8x96xf32>
    %c0_195 = arith.constant 0 : index
    %c0_196 = arith.constant 0 : index
    %473 = vector.load %arg8[%c0_195, %c0_196] : memref<1x96xf32, #tpu.memory_space<vmem>>, vector<1x96xf32>
    %474 = vector.broadcast %473 : vector<1x96xf32> to vector<8x96xf32>
    %475 = arith.addf %472, %474 : vector<8x96xf32>
    %476 = vector.extract_strided_slice %470 {offsets = [0, 0], sizes = [8, 32], strides = [1, 1]} : vector<8x96xf32> to vector<8x32xf32>
    %477 = vector.extract_strided_slice %475 {offsets = [0, 0], sizes = [8, 32], strides = [1, 1]} : vector<8x96xf32> to vector<8x32xf32>
    %478 = arith.addf %476, %477 : vector<8x32xf32>
    %479 = arith.negf %478 : vector<8x32xf32>
    %480 = math.exp %479 : vector<8x32xf32>
    %cst_197 = arith.constant 1.000000e+00 : f32
    %481 = vector.broadcast %cst_197 : f32 to vector<8x32xf32>
    %482 = arith.addf %481, %480 : vector<8x32xf32>
    %483 = arith.divf %481, %482 : vector<8x32xf32>
    %484 = vector.extract_strided_slice %470 {offsets = [0, 32], sizes = [8, 32], strides = [1, 1]} : vector<8x96xf32> to vector<8x32xf32>
    %485 = vector.extract_strided_slice %475 {offsets = [0, 32], sizes = [8, 32], strides = [1, 1]} : vector<8x96xf32> to vector<8x32xf32>
    %486 = arith.addf %484, %485 : vector<8x32xf32>
    %487 = arith.negf %486 : vector<8x32xf32>
    %488 = math.exp %487 : vector<8x32xf32>
    %cst_198 = arith.constant 1.000000e+00 : f32
    %489 = vector.broadcast %cst_198 : f32 to vector<8x32xf32>
    %490 = arith.addf %489, %488 : vector<8x32xf32>
    %491 = arith.divf %489, %490 : vector<8x32xf32>
    %492 = vector.extract_strided_slice %470 {offsets = [0, 64], sizes = [8, 32], strides = [1, 1]} : vector<8x96xf32> to vector<8x32xf32>
    %493 = vector.extract_strided_slice %475 {offsets = [0, 64], sizes = [8, 32], strides = [1, 1]} : vector<8x96xf32> to vector<8x32xf32>
    %494 = arith.mulf %483, %493 : vector<8x32xf32>
    %495 = arith.addf %492, %494 : vector<8x32xf32>
    %496 = math.tanh %495 : vector<8x32xf32>
    %cst_199 = arith.constant 1.000000e+00 : f32
    %497 = vector.broadcast %cst_199 : f32 to vector<8x32xf32>
    %498 = arith.subf %497, %491 : vector<8x32xf32>
    %499 = arith.mulf %498, %496 : vector<8x32xf32>
    %500 = arith.mulf %491, %462 : vector<8x32xf32>
    %501 = arith.addf %499, %500 : vector<8x32xf32>
    %c4_i32_200 = arith.constant 4 : i32
    %502 = arith.index_cast %c4_i32_200 : i32 to index
    %c0_201 = arith.constant 0 : index
    %c0_202 = arith.constant 0 : index
    %503 = vector.load %arg12[%502, %c0_201, %c0_202] : memref<8x8x32xf32, #tpu.memory_space<vmem>>, vector<1x8x32xf32>
    %504 = vector.shape_cast %503 : vector<1x8x32xf32> to vector<8x32xf32>
    %c0_203 = arith.constant 0 : index
    %c0_204 = arith.constant 0 : index
    %505 = vector.load %arg5[%c0_203, %c0_204] : memref<32x96xf32, #tpu.memory_space<vmem>>, vector<32x96xf32>
    %cst_205 = arith.constant dense<0.000000e+00> : vector<8x96xf32>
    %506 = tpu.matmul %504, %505, %cst_205 {dimension_numbers = #tpu.dot_dimension_numbers<[1], [0], [0], [1], [0, 0, 1, 1], [], []>} : vector<8x32xf32>, vector<32x96xf32>, vector<8x96xf32> -> vector<8x96xf32>
    %c0_206 = arith.constant 0 : index
    %c0_207 = arith.constant 0 : index
    %507 = vector.load %arg7[%c0_206, %c0_207] : memref<1x96xf32, #tpu.memory_space<vmem>>, vector<1x96xf32>
    %508 = vector.broadcast %507 : vector<1x96xf32> to vector<8x96xf32>
    %509 = arith.addf %506, %508 : vector<8x96xf32>
    %c0_208 = arith.constant 0 : index
    %c0_209 = arith.constant 0 : index
    %510 = vector.load %arg6[%c0_208, %c0_209] : memref<32x96xf32, #tpu.memory_space<vmem>>, vector<32x96xf32>
    %cst_210 = arith.constant dense<0.000000e+00> : vector<8x96xf32>
    %511 = tpu.matmul %501, %510, %cst_210 {dimension_numbers = #tpu.dot_dimension_numbers<[1], [0], [0], [1], [0, 0, 1, 1], [], []>} : vector<8x32xf32>, vector<32x96xf32>, vector<8x96xf32> -> vector<8x96xf32>
    %c0_211 = arith.constant 0 : index
    %c0_212 = arith.constant 0 : index
    %512 = vector.load %arg8[%c0_211, %c0_212] : memref<1x96xf32, #tpu.memory_space<vmem>>, vector<1x96xf32>
    %513 = vector.broadcast %512 : vector<1x96xf32> to vector<8x96xf32>
    %514 = arith.addf %511, %513 : vector<8x96xf32>
    %515 = vector.extract_strided_slice %509 {offsets = [0, 0], sizes = [8, 32], strides = [1, 1]} : vector<8x96xf32> to vector<8x32xf32>
    %516 = vector.extract_strided_slice %514 {offsets = [0, 0], sizes = [8, 32], strides = [1, 1]} : vector<8x96xf32> to vector<8x32xf32>
    %517 = arith.addf %515, %516 : vector<8x32xf32>
    %518 = arith.negf %517 : vector<8x32xf32>
    %519 = math.exp %518 : vector<8x32xf32>
    %cst_213 = arith.constant 1.000000e+00 : f32
    %520 = vector.broadcast %cst_213 : f32 to vector<8x32xf32>
    %521 = arith.addf %520, %519 : vector<8x32xf32>
    %522 = arith.divf %520, %521 : vector<8x32xf32>
    %523 = vector.extract_strided_slice %509 {offsets = [0, 32], sizes = [8, 32], strides = [1, 1]} : vector<8x96xf32> to vector<8x32xf32>
    %524 = vector.extract_strided_slice %514 {offsets = [0, 32], sizes = [8, 32], strides = [1, 1]} : vector<8x96xf32> to vector<8x32xf32>
    %525 = arith.addf %523, %524 : vector<8x32xf32>
    %526 = arith.negf %525 : vector<8x32xf32>
    %527 = math.exp %526 : vector<8x32xf32>
    %cst_214 = arith.constant 1.000000e+00 : f32
    %528 = vector.broadcast %cst_214 : f32 to vector<8x32xf32>
    %529 = arith.addf %528, %527 : vector<8x32xf32>
    %530 = arith.divf %528, %529 : vector<8x32xf32>
    %531 = vector.extract_strided_slice %509 {offsets = [0, 64], sizes = [8, 32], strides = [1, 1]} : vector<8x96xf32> to vector<8x32xf32>
    %532 = vector.extract_strided_slice %514 {offsets = [0, 64], sizes = [8, 32], strides = [1, 1]} : vector<8x96xf32> to vector<8x32xf32>
    %533 = arith.mulf %522, %532 : vector<8x32xf32>
    %534 = arith.addf %531, %533 : vector<8x32xf32>
    %535 = math.tanh %534 : vector<8x32xf32>
    %cst_215 = arith.constant 1.000000e+00 : f32
    %536 = vector.broadcast %cst_215 : f32 to vector<8x32xf32>
    %537 = arith.subf %536, %530 : vector<8x32xf32>
    %538 = arith.mulf %537, %535 : vector<8x32xf32>
    %539 = arith.mulf %530, %501 : vector<8x32xf32>
    %540 = arith.addf %538, %539 : vector<8x32xf32>
    %c5_i32_216 = arith.constant 5 : i32
    %541 = arith.index_cast %c5_i32_216 : i32 to index
    %c0_217 = arith.constant 0 : index
    %c0_218 = arith.constant 0 : index
    %542 = vector.load %arg12[%541, %c0_217, %c0_218] : memref<8x8x32xf32, #tpu.memory_space<vmem>>, vector<1x8x32xf32>
    %543 = vector.shape_cast %542 : vector<1x8x32xf32> to vector<8x32xf32>
    %c0_219 = arith.constant 0 : index
    %c0_220 = arith.constant 0 : index
    %544 = vector.load %arg5[%c0_219, %c0_220] : memref<32x96xf32, #tpu.memory_space<vmem>>, vector<32x96xf32>
    %cst_221 = arith.constant dense<0.000000e+00> : vector<8x96xf32>
    %545 = tpu.matmul %543, %544, %cst_221 {dimension_numbers = #tpu.dot_dimension_numbers<[1], [0], [0], [1], [0, 0, 1, 1], [], []>} : vector<8x32xf32>, vector<32x96xf32>, vector<8x96xf32> -> vector<8x96xf32>
    %c0_222 = arith.constant 0 : index
    %c0_223 = arith.constant 0 : index
    %546 = vector.load %arg7[%c0_222, %c0_223] : memref<1x96xf32, #tpu.memory_space<vmem>>, vector<1x96xf32>
    %547 = vector.broadcast %546 : vector<1x96xf32> to vector<8x96xf32>
    %548 = arith.addf %545, %547 : vector<8x96xf32>
    %c0_224 = arith.constant 0 : index
    %c0_225 = arith.constant 0 : index
    %549 = vector.load %arg6[%c0_224, %c0_225] : memref<32x96xf32, #tpu.memory_space<vmem>>, vector<32x96xf32>
    %cst_226 = arith.constant dense<0.000000e+00> : vector<8x96xf32>
    %550 = tpu.matmul %540, %549, %cst_226 {dimension_numbers = #tpu.dot_dimension_numbers<[1], [0], [0], [1], [0, 0, 1, 1], [], []>} : vector<8x32xf32>, vector<32x96xf32>, vector<8x96xf32> -> vector<8x96xf32>
    %c0_227 = arith.constant 0 : index
    %c0_228 = arith.constant 0 : index
    %551 = vector.load %arg8[%c0_227, %c0_228] : memref<1x96xf32, #tpu.memory_space<vmem>>, vector<1x96xf32>
    %552 = vector.broadcast %551 : vector<1x96xf32> to vector<8x96xf32>
    %553 = arith.addf %550, %552 : vector<8x96xf32>
    %554 = vector.extract_strided_slice %548 {offsets = [0, 0], sizes = [8, 32], strides = [1, 1]} : vector<8x96xf32> to vector<8x32xf32>
    %555 = vector.extract_strided_slice %553 {offsets = [0, 0], sizes = [8, 32], strides = [1, 1]} : vector<8x96xf32> to vector<8x32xf32>
    %556 = arith.addf %554, %555 : vector<8x32xf32>
    %557 = arith.negf %556 : vector<8x32xf32>
    %558 = math.exp %557 : vector<8x32xf32>
    %cst_229 = arith.constant 1.000000e+00 : f32
    %559 = vector.broadcast %cst_229 : f32 to vector<8x32xf32>
    %560 = arith.addf %559, %558 : vector<8x32xf32>
    %561 = arith.divf %559, %560 : vector<8x32xf32>
    %562 = vector.extract_strided_slice %548 {offsets = [0, 32], sizes = [8, 32], strides = [1, 1]} : vector<8x96xf32> to vector<8x32xf32>
    %563 = vector.extract_strided_slice %553 {offsets = [0, 32], sizes = [8, 32], strides = [1, 1]} : vector<8x96xf32> to vector<8x32xf32>
    %564 = arith.addf %562, %563 : vector<8x32xf32>
    %565 = arith.negf %564 : vector<8x32xf32>
    %566 = math.exp %565 : vector<8x32xf32>
    %cst_230 = arith.constant 1.000000e+00 : f32
    %567 = vector.broadcast %cst_230 : f32 to vector<8x32xf32>
    %568 = arith.addf %567, %566 : vector<8x32xf32>
    %569 = arith.divf %567, %568 : vector<8x32xf32>
    %570 = vector.extract_strided_slice %548 {offsets = [0, 64], sizes = [8, 32], strides = [1, 1]} : vector<8x96xf32> to vector<8x32xf32>
    %571 = vector.extract_strided_slice %553 {offsets = [0, 64], sizes = [8, 32], strides = [1, 1]} : vector<8x96xf32> to vector<8x32xf32>
    %572 = arith.mulf %561, %571 : vector<8x32xf32>
    %573 = arith.addf %570, %572 : vector<8x32xf32>
    %574 = math.tanh %573 : vector<8x32xf32>
    %cst_231 = arith.constant 1.000000e+00 : f32
    %575 = vector.broadcast %cst_231 : f32 to vector<8x32xf32>
    %576 = arith.subf %575, %569 : vector<8x32xf32>
    %577 = arith.mulf %576, %574 : vector<8x32xf32>
    %578 = arith.mulf %569, %540 : vector<8x32xf32>
    %579 = arith.addf %577, %578 : vector<8x32xf32>
    %c6_i32_232 = arith.constant 6 : i32
    %580 = arith.index_cast %c6_i32_232 : i32 to index
    %c0_233 = arith.constant 0 : index
    %c0_234 = arith.constant 0 : index
    %581 = vector.load %arg12[%580, %c0_233, %c0_234] : memref<8x8x32xf32, #tpu.memory_space<vmem>>, vector<1x8x32xf32>
    %582 = vector.shape_cast %581 : vector<1x8x32xf32> to vector<8x32xf32>
    %c0_235 = arith.constant 0 : index
    %c0_236 = arith.constant 0 : index
    %583 = vector.load %arg5[%c0_235, %c0_236] : memref<32x96xf32, #tpu.memory_space<vmem>>, vector<32x96xf32>
    %cst_237 = arith.constant dense<0.000000e+00> : vector<8x96xf32>
    %584 = tpu.matmul %582, %583, %cst_237 {dimension_numbers = #tpu.dot_dimension_numbers<[1], [0], [0], [1], [0, 0, 1, 1], [], []>} : vector<8x32xf32>, vector<32x96xf32>, vector<8x96xf32> -> vector<8x96xf32>
    %c0_238 = arith.constant 0 : index
    %c0_239 = arith.constant 0 : index
    %585 = vector.load %arg7[%c0_238, %c0_239] : memref<1x96xf32, #tpu.memory_space<vmem>>, vector<1x96xf32>
    %586 = vector.broadcast %585 : vector<1x96xf32> to vector<8x96xf32>
    %587 = arith.addf %584, %586 : vector<8x96xf32>
    %c0_240 = arith.constant 0 : index
    %c0_241 = arith.constant 0 : index
    %588 = vector.load %arg6[%c0_240, %c0_241] : memref<32x96xf32, #tpu.memory_space<vmem>>, vector<32x96xf32>
    %cst_242 = arith.constant dense<0.000000e+00> : vector<8x96xf32>
    %589 = tpu.matmul %579, %588, %cst_242 {dimension_numbers = #tpu.dot_dimension_numbers<[1], [0], [0], [1], [0, 0, 1, 1], [], []>} : vector<8x32xf32>, vector<32x96xf32>, vector<8x96xf32> -> vector<8x96xf32>
    %c0_243 = arith.constant 0 : index
    %c0_244 = arith.constant 0 : index
    %590 = vector.load %arg8[%c0_243, %c0_244] : memref<1x96xf32, #tpu.memory_space<vmem>>, vector<1x96xf32>
    %591 = vector.broadcast %590 : vector<1x96xf32> to vector<8x96xf32>
    %592 = arith.addf %589, %591 : vector<8x96xf32>
    %593 = vector.extract_strided_slice %587 {offsets = [0, 0], sizes = [8, 32], strides = [1, 1]} : vector<8x96xf32> to vector<8x32xf32>
    %594 = vector.extract_strided_slice %592 {offsets = [0, 0], sizes = [8, 32], strides = [1, 1]} : vector<8x96xf32> to vector<8x32xf32>
    %595 = arith.addf %593, %594 : vector<8x32xf32>
    %596 = arith.negf %595 : vector<8x32xf32>
    %597 = math.exp %596 : vector<8x32xf32>
    %cst_245 = arith.constant 1.000000e+00 : f32
    %598 = vector.broadcast %cst_245 : f32 to vector<8x32xf32>
    %599 = arith.addf %598, %597 : vector<8x32xf32>
    %600 = arith.divf %598, %599 : vector<8x32xf32>
    %601 = vector.extract_strided_slice %587 {offsets = [0, 32], sizes = [8, 32], strides = [1, 1]} : vector<8x96xf32> to vector<8x32xf32>
    %602 = vector.extract_strided_slice %592 {offsets = [0, 32], sizes = [8, 32], strides = [1, 1]} : vector<8x96xf32> to vector<8x32xf32>
    %603 = arith.addf %601, %602 : vector<8x32xf32>
    %604 = arith.negf %603 : vector<8x32xf32>
    %605 = math.exp %604 : vector<8x32xf32>
    %cst_246 = arith.constant 1.000000e+00 : f32
    %606 = vector.broadcast %cst_246 : f32 to vector<8x32xf32>
    %607 = arith.addf %606, %605 : vector<8x32xf32>
    %608 = arith.divf %606, %607 : vector<8x32xf32>
    %609 = vector.extract_strided_slice %587 {offsets = [0, 64], sizes = [8, 32], strides = [1, 1]} : vector<8x96xf32> to vector<8x32xf32>
    %610 = vector.extract_strided_slice %592 {offsets = [0, 64], sizes = [8, 32], strides = [1, 1]} : vector<8x96xf32> to vector<8x32xf32>
    %611 = arith.mulf %600, %610 : vector<8x32xf32>
    %612 = arith.addf %609, %611 : vector<8x32xf32>
    %613 = math.tanh %612 : vector<8x32xf32>
    %cst_247 = arith.constant 1.000000e+00 : f32
    %614 = vector.broadcast %cst_247 : f32 to vector<8x32xf32>
    %615 = arith.subf %614, %608 : vector<8x32xf32>
    %616 = arith.mulf %615, %613 : vector<8x32xf32>
    %617 = arith.mulf %608, %579 : vector<8x32xf32>
    %618 = arith.addf %616, %617 : vector<8x32xf32>
    %c7_i32_248 = arith.constant 7 : i32
    %619 = arith.index_cast %c7_i32_248 : i32 to index
    %c0_249 = arith.constant 0 : index
    %c0_250 = arith.constant 0 : index
    %620 = vector.load %arg12[%619, %c0_249, %c0_250] : memref<8x8x32xf32, #tpu.memory_space<vmem>>, vector<1x8x32xf32>
    %621 = vector.shape_cast %620 : vector<1x8x32xf32> to vector<8x32xf32>
    %c0_251 = arith.constant 0 : index
    %c0_252 = arith.constant 0 : index
    %622 = vector.load %arg5[%c0_251, %c0_252] : memref<32x96xf32, #tpu.memory_space<vmem>>, vector<32x96xf32>
    %cst_253 = arith.constant dense<0.000000e+00> : vector<8x96xf32>
    %623 = tpu.matmul %621, %622, %cst_253 {dimension_numbers = #tpu.dot_dimension_numbers<[1], [0], [0], [1], [0, 0, 1, 1], [], []>} : vector<8x32xf32>, vector<32x96xf32>, vector<8x96xf32> -> vector<8x96xf32>
    %c0_254 = arith.constant 0 : index
    %c0_255 = arith.constant 0 : index
    %624 = vector.load %arg7[%c0_254, %c0_255] : memref<1x96xf32, #tpu.memory_space<vmem>>, vector<1x96xf32>
    %625 = vector.broadcast %624 : vector<1x96xf32> to vector<8x96xf32>
    %626 = arith.addf %623, %625 : vector<8x96xf32>
    %c0_256 = arith.constant 0 : index
    %c0_257 = arith.constant 0 : index
    %627 = vector.load %arg6[%c0_256, %c0_257] : memref<32x96xf32, #tpu.memory_space<vmem>>, vector<32x96xf32>
    %cst_258 = arith.constant dense<0.000000e+00> : vector<8x96xf32>
    %628 = tpu.matmul %618, %627, %cst_258 {dimension_numbers = #tpu.dot_dimension_numbers<[1], [0], [0], [1], [0, 0, 1, 1], [], []>} : vector<8x32xf32>, vector<32x96xf32>, vector<8x96xf32> -> vector<8x96xf32>
    %c0_259 = arith.constant 0 : index
    %c0_260 = arith.constant 0 : index
    %629 = vector.load %arg8[%c0_259, %c0_260] : memref<1x96xf32, #tpu.memory_space<vmem>>, vector<1x96xf32>
    %630 = vector.broadcast %629 : vector<1x96xf32> to vector<8x96xf32>
    %631 = arith.addf %628, %630 : vector<8x96xf32>
    %632 = vector.extract_strided_slice %626 {offsets = [0, 0], sizes = [8, 32], strides = [1, 1]} : vector<8x96xf32> to vector<8x32xf32>
    %633 = vector.extract_strided_slice %631 {offsets = [0, 0], sizes = [8, 32], strides = [1, 1]} : vector<8x96xf32> to vector<8x32xf32>
    %634 = arith.addf %632, %633 : vector<8x32xf32>
    %635 = arith.negf %634 : vector<8x32xf32>
    %636 = math.exp %635 : vector<8x32xf32>
    %cst_261 = arith.constant 1.000000e+00 : f32
    %637 = vector.broadcast %cst_261 : f32 to vector<8x32xf32>
    %638 = arith.addf %637, %636 : vector<8x32xf32>
    %639 = arith.divf %637, %638 : vector<8x32xf32>
    %640 = vector.extract_strided_slice %626 {offsets = [0, 32], sizes = [8, 32], strides = [1, 1]} : vector<8x96xf32> to vector<8x32xf32>
    %641 = vector.extract_strided_slice %631 {offsets = [0, 32], sizes = [8, 32], strides = [1, 1]} : vector<8x96xf32> to vector<8x32xf32>
    %642 = arith.addf %640, %641 : vector<8x32xf32>
    %643 = arith.negf %642 : vector<8x32xf32>
    %644 = math.exp %643 : vector<8x32xf32>
    %cst_262 = arith.constant 1.000000e+00 : f32
    %645 = vector.broadcast %cst_262 : f32 to vector<8x32xf32>
    %646 = arith.addf %645, %644 : vector<8x32xf32>
    %647 = arith.divf %645, %646 : vector<8x32xf32>
    %648 = vector.extract_strided_slice %626 {offsets = [0, 64], sizes = [8, 32], strides = [1, 1]} : vector<8x96xf32> to vector<8x32xf32>
    %649 = vector.extract_strided_slice %631 {offsets = [0, 64], sizes = [8, 32], strides = [1, 1]} : vector<8x96xf32> to vector<8x32xf32>
    %650 = arith.mulf %639, %649 : vector<8x32xf32>
    %651 = arith.addf %648, %650 : vector<8x32xf32>
    %652 = math.tanh %651 : vector<8x32xf32>
    %cst_263 = arith.constant 1.000000e+00 : f32
    %653 = vector.broadcast %cst_263 : f32 to vector<8x32xf32>
    %654 = arith.subf %653, %647 : vector<8x32xf32>
    %655 = arith.mulf %654, %652 : vector<8x32xf32>
    %656 = arith.mulf %647, %618 : vector<8x32xf32>
    %657 = arith.addf %655, %656 : vector<8x32xf32>
    %c8_i32_264 = arith.constant 8 : i32
    %c0_265 = arith.constant 0 : index
    %c0_266 = arith.constant 0 : index
    %658 = vector.load %arg9[%c0_265, %c0_266] : memref<32x4xf32, #tpu.memory_space<vmem>>, vector<32x4xf32>
    %cst_267 = arith.constant dense<0.000000e+00> : vector<8x4xf32>
    %659 = tpu.matmul %657, %658, %cst_267 {dimension_numbers = #tpu.dot_dimension_numbers<[1], [0], [0], [1], [0, 0, 1, 1], [], []>} : vector<8x32xf32>, vector<32x4xf32>, vector<8x4xf32> -> vector<8x4xf32>
    %c0_268 = arith.constant 0 : index
    %c0_269 = arith.constant 0 : index
    %660 = vector.load %arg10[%c0_268, %c0_269] : memref<1x4xf32, #tpu.memory_space<vmem>>, vector<1x4xf32>
    %661 = vector.broadcast %660 : vector<1x4xf32> to vector<8x4xf32>
    %662 = arith.addf %659, %661 : vector<8x4xf32>
    %c0_270 = arith.constant 0 : index
    %c0_271 = arith.constant 0 : index
    %663 = vector.load %arg11[%c0_270, %c0_271] : memref<8x4xf32, #tpu.memory_space<vmem>>, vector<8x4xf32>
    tpu.vector_store %arg11[%c0_270, %c0_271], %662 {strides = array<i32>} : memref<8x4xf32, #tpu.memory_space<vmem>>, vector<8x4xf32>,
    return
  }
}

</mosaic_0001>

<bundles_post_ra>
// kernel: gru_model_forward.1
= control target key start
LH: loop header
LB: loop body
LE: loop exit
PB: predicated region body
PF: predicated region fallthrough
CT: control target
= control target key end

     0   :  { %v3795_v0 = vmov 0.0   ;;  %vm48_vm0 = vcmask 130048   ;;  %vm3796_vm1 = vmmov 0   ;;  %s3797_s12 = smov 64   ;;  %s3798_s17 = smov 96   ;;  %vm133_vm2 = vcmask 261120   ;;  %s4468_s2 = inlined_call_operand.vmem [shape: f32[32,96], index: 2, kind: input, shape index: {}]   ;;  %s4469_s1 = inlined_call_operand.vmem [shape: f32[16,96], index: 1, kind: input, shape index: {}]   ;;  %s4470_s0 = inlined_call_operand.vmem [shape: f32[8,8,16], index: 0, kind: input, shape index: {}]   ;;  %s4471_s4 = inlined_call_operand.vmem [shape: f32[1,96], index: 4, kind: input, shape index: {}]   ;;  %s4472_s3 = inlined_call_operand.vmem [shape: f32[1,96], index: 3, kind: input, shape index: {}]   ;;  %s4473_s5 = inlined_call_operand.vmem [shape: f32[32,96], index: 5, kind: input, shape index: {}]   ;;  %s4474_s6 = inlined_call_operand.vmem [shape: f32[32,96], index: 6, kind: input, shape index: {}]   ;;  %s4475_s8 = inlined_call_operand.vmem [shape: f32[1,96], index: 8, kind: input, shape index: {}]   ;;  %s4476_s7 = inlined_call_operand.vmem [shape: f32[1,96], index: 7, kind: input, shape index: {}]   ;;  %s4477_s9 = inlined_call_operand.vmem [shape: f32[32,4], index: 9, kind: input, shape index: {}]   ;;  %s4478_s10 = inlined_call_operand.vmem [shape: f32[1,4], index: 10, kind: input, shape index: {}]   ;;  %s4479_s11 = inlined_call_operand.vmem [shape: f32[8,4], index: 11, kind: output, shape index: {}]  }
   0x1   :  { %3369 = vmatprep.subr.mxu1 %v3795_v0  ;;  %v3863_v1 = vld [vmem:[%s4468_s2 + $0x18] sm:$0xff]  ;;  %v3868_v2 = vld [vmem:[%s4468_s2 + $0x10] sm:$0xff]  ;;  %3362 = vmatprep.subr.mxu0 %v3795_v0  ;;  %v3874_v3 = vld [vmem:[%s4469_s1 + $0x8] sm:$0xff]  ;;  %vm3134_vm3 = vcmask 31744  }
   0x2   :  { %3370 = vmatpush3.msra.mxu1 %v3863_v1  ;;  %3363 = vmatpush3.msra.mxu0 %v3874_v3  ;;  %v3881_v4 = vld [vmem:[%s4469_s1] sm:$0xff]  ;;  %v3887_v5 = vld [vmem:[%s4468_s2 + $0x8] sm:$0xff]  ;;  %v3150_v48 = vld [vmem:[%s4470_s0 + $0x10] sm:$0xff] }
   0x3   :  { %3371 = vmatprep.subr.mxu1 %v3795_v0  ;;  %3364 = vmatprep.subr.mxu0 %v3795_v0  ;;  %v38_v6 = vld [vmem:[%s4470_s0] sm:$0xff]  ;;  %v3144_v25 = vld [vmem:[%s4470_s0 + $0x8] sm:$0xff] }
   0x4   :  { %3372 = vmatpush3.msra.mxu1 %v3868_v2  ;;  %3365 = vmatpush3.msra.mxu0 %v3881_v4  ;;  %v3901_v7 = vld [vmem:[%s4468_s2] sm:$0xff] }
   0x5   :  { %3373 = vmatprep.subr.mxu1 %v3795_v0  ;;  %3366 = vmatprep.mubr.msk.f32.mxu0 %vm3796_vm1, %v3795_v0  ;;  %v3927_v9 = vld [vmem:[%s4471_s4] ss:$0 sm:$0xff] }
   0x6   :  { %3374 = vmatpush3.msra.mxu1 %v3887_v5  ;;  %3377 = vmatprep.mubr.msk.f32.mxu1 %vm3796_vm1, %v3795_v0  ;;  %v3934_v14 = vld [vmem:[%s4472_s3] ss:$0 sm:$0xff] }
   0x7   :  { %3375 = vmatprep.subr.mxu1 %v3795_v0  ;;  %3367 = vmatmul.mubr.msk.f32.vlgmr.msra.gmra.mxu0 %vm48_vm0, %v38_v6 }
   0x8   :  { %3376 = vmatpush3.msra.mxu1 %v3901_v7  ;;  %3380 = vmatprep.subr.mxu0 %v3795_v0 }
   0x9   :  { %3378 = vmatmul.mubr.f32.vlgmr.msra.gmra.mxu1 %v3795_v0  ;;  %3381 = vmatpush3.msra.mxu0 %v3874_v3 }
   0xa   :  { %3382 = vmatprep.subr.mxu0 %v3795_v0  ;;  %3384 = vmatprep.mubr.msk.f32.mxu0 %vm3796_vm1, %v3795_v0 }
   0xb   :  { %3383 = vmatpush3.msra.mxu0 %v3881_v4  ;;  %3398 = vmatprep.subr.mxu1 %v3795_v0 }
   0xc   :  { %3387 = vmatprep.subr.mxu0 %v3795_v0  ;;  %3399 = vmatpush3.msra.mxu1 %v3874_v3 }
   0xd   :  { %3400 = vmatprep.subr.mxu1 %v3795_v0  ;;  %3402 = vmatprep.mubr.msk.f32.mxu1 %vm3796_vm1, %v3795_v0 }
   0xe   :  { %3401 = vmatpush3.msra.mxu1 %v3881_v4  ;;  %3385 = vmatmul.mubr.msk.f32.vlgmr.msra.gmra.mxu0 %vm48_vm0, %v3144_v25 }
   0xf   :  { %3405 = vmatprep.subr.mxu1 %v3795_v0  ;;  %3388 = vmatpush3.msra.mxu0 %v3863_v1 }
  0x10   :  { %3395 = vmatprep.mubr.msk.f32.mxu0 %vm3796_vm1, %v3795_v0  ;;  %3389 = vmatprep.subr.mxu0 %v3795_v0 }
  0x11   :  { %3390 = vmatpush3.msra.mxu0 %v3868_v2  ;;  %3403 = vmatmul.mubr.msk.f32.vlgmr.msra.gmra.mxu1 %vm48_vm0, %v3150_v48 }
  0x12   :  { %3391 = vmatprep.subr.mxu0 %v3795_v0  ;;  %3406 = vmatpush3.msra.mxu1 %v3863_v1 }
  0x13   :  { %3392 = vmatpush3.msra.mxu0 %v3887_v5  ;;  %3413 = vmatprep.mubr.msk.f32.mxu1 %vm3796_vm1, %v3795_v0 }
  0x14   :  { %3393 = vmatprep.subr.mxu0 %v3795_v0  ;;  %3407 = vmatprep.subr.mxu1 %v3795_v0 }
  0x15   :  { %3394 = vmatpush3.msra.mxu0 %v3901_v7  ;;  %3408 = vmatpush3.msra.mxu1 %v3868_v2 }
  0x16   :  { %3416 = vmatprep.subr.mxu0 %v3795_v0  ;;  %3409 = vmatprep.subr.mxu1 %v3795_v0 }
  0x17   :  { %3410 = vmatpush3.msra.mxu1 %v3887_v5 }
  0x18   :  { %3411 = vmatprep.subr.mxu1 %v3795_v0 }
  0x19   :  { %3412 = vmatpush3.msra.mxu1 %v3901_v7 }
  0x1a   :  { %3434 = vmatprep.subr.mxu1 %v3795_v0 }
  0xc7   :  { %v118_v8 = vpop.f32.mrf.mxu0 }
  0xc8   :  { %v119_v15 = vadd.f32 %v3934_v14, %v118_v8 }
  0xc9   :  { %v203_v10 = vpop.f32.mrf.mxu1  ;;  %v3368_v11 = vpop.f32.mrf.mxu0 }
  0xca   :  { %v204_v12 = vadd.f32 %v3927_v9, %v203_v10 }
  0xcb   :  { %v3379_v13 = vpop.f32.mrf.mxu1 }
  0xcc   :  { %215 = vrot.lane.b32.xlu0 %v204_v12, %s3797_s12  ;;  %v207_v16 = vadd.f32 %v204_v12, %v119_v15 }
  0xce   :  { %v3143_v17 = vmul.f32 -1.442695, %v207_v16  ;;  %v318_v32 = vpop.f32.mrf.mxu0  ;;  %v3156_v16 = vld [vmem:[%s4470_s0 + $0x18] sm:$0xff] }
  0xcf   :  { %v319_v38 = vadd.f32 %v3934_v14, %v318_v32 }
  0xd0   :  { %3697 = vpow2.f32 %v3143_v17  ;;  %v3386_v33 = vpop.f32.mrf.mxu0 }
  0xd1   :  { %v517_v55 = vpop.f32.mrf.mxu1 }
  0xd2   :  { %v518_v61 = vadd.f32 %v3934_v14, %v517_v55 }
  0xd3   :  { %v3404_v56 = vpop.f32.mrf.mxu1 }
  0xdd   :  { %v3698_v18 = vpop.eup %3697 }
  0xde   :  { %v211_v19 = vadd.f32 1.0, %v3698_v18 }
  0xe0   :  { %3699 = vrcp.f32 %v211_v19 }
  0xed   :  { %v3700_v20 = vpop.eup %3699 }
  0xee   :  { %v225_v27 = vsub.f32 1.0, %v3700_v20  ;;  %v231_v29 = vmul.f32 0.0, %v3700_v20 }
 0x13e   :  { %v216_v21 = vpop.permute.xlu0 %215 }
 0x13f   :  { %v218_v22 = vmul.f32 %v3700_v20, %v216_v21 }
 0x141   :  { %220 = vrot.lane.b32.xlu0 %v218_v22, %s3797_s12 }
 0x1b3   :  { %v221_v23 = vpop.permute.xlu0 %220 }
 0x1b4   :  { %v223_v24 = vadd.f32 %v221_v23, %v119_v15 }
 0x1b6   :  { %3701 = vtanh.f32 %v223_v24 }
 0x1c3   :  { %v3702_v26 = vpop.eup %3701 }
 0x1c4   :  { %227 = vrot.lane.b32.xlu1 %v3702_v26, %s3798_s17 }
 0x236   :  { %v228_v28 = vpop.permute.xlu1 %227 }
 0x237   :  { %v230_v30 = vmul.f32 %v228_v28, %v225_v27 }
 0x239   :  { %v232_v31 = vadd.f32 %v231_v29, %v230_v30 }
 0x23b   :  { %234 = vrot.lane.b32.xlu1 %v232_v31, %s3798_s17 }
 0x2ad   :  { %v235_v34 = vpop.permute.xlu1 %234 }
 0x2ae   :  { %237 = vst.msk [vmem:[#allocation2] sm:$0xff] %vm133_vm2, %v235_v34  ;;  %3396 = vmatmul.mubr.msk.f32.vlgmr.msra.gmra.mxu0 %vm133_vm2, %v235_v34 }
 0x2af   :  { %3417 = vmatpush3.msra.mxu0 %v3874_v3  ;;  %3420 = vmatprep.mubr.msk.f32.mxu0 %vm3796_vm1, %v3795_v0 }
 0x2b0   :  { %3418 = vmatprep.subr.mxu0 %v3795_v0 }
 0x2b1   :  { %3419 = vmatpush3.msra.mxu0 %v3881_v4 }
 0x2b2   :  { %3423 = vmatprep.subr.mxu0 %v3795_v0  ;;  %3421 = vmatmul.mubr.msk.f32.vlgmr.msra.gmra.mxu0 %vm48_vm0, %v3156_v16 }
 0x2b3   :  { %3424 = vmatpush3.msra.mxu0 %v3863_v1  ;;  %3431 = vmatprep.mubr.msk.f32.mxu0 %vm3796_vm1, %v3795_v0 }
 0x2b4   :  { %3425 = vmatprep.subr.mxu0 %v3795_v0 }
 0x2b5   :  { %3426 = vmatpush3.msra.mxu0 %v3868_v2 }
 0x2b6   :  { %3427 = vmatprep.subr.mxu0 %v3795_v0 }
 0x2b7   :  { %3428 = vmatpush3.msra.mxu0 %v3887_v5 }
 0x2b8   :  { %3429 = vmatprep.subr.mxu0 %v3795_v0 }
 0x2b9   :  { %3430 = vmatpush3.msra.mxu0 %v3901_v7 }
 0x2ba   :  { %3452 = vmatprep.subr.mxu0 %v3795_v0 }
 0x36e   :  { %v401_v35 = vpop.f32.mrf.mxu0 }
 0x36f   :  { %v402_v36 = vadd.f32 %v3927_v9, %v401_v35 }
 0x370   :  { %v3397_v37 = vpop.f32.mrf.mxu0 }
 0x371   :  { %413 = vrot.lane.b32.xlu0 %v402_v36, %s3797_s12  ;;  %v405_v39 = vadd.f32 %v402_v36, %v319_v38 }
 0x372   :  { %v716_v23 = vpop.f32.mrf.mxu0 }
 0x373   :  { %v3149_v40 = vmul.f32 -1.442695, %v405_v39  ;;  %v717_v29 = vadd.f32 %v3934_v14, %v716_v23  ;;  %v3162_v39 = vld [vmem:[%s4470_s0 + $0x20] sm:$0xff] }
 0x374   :  { %v3422_v24 = vpop.f32.mrf.mxu0 }
 0x375   :  { %3703 = vpow2.f32 %v3149_v40 }
 0x382   :  { %v3704_v41 = vpop.eup %3703 }
 0x383   :  { %v409_v42 = vadd.f32 1.0, %v3704_v41 }
 0x385   :  { %3705 = vrcp.f32 %v409_v42 }
 0x392   :  { %v3706_v43 = vpop.eup %3705 }
 0x393   :  { %v423_v50 = vsub.f32 1.0, %v3706_v43  ;;  %v429_v52 = vmul.f32 %v3706_v43, %v232_v31 }
 0x3e3   :  { %v414_v44 = vpop.permute.xlu0 %413 }
 0x3e4   :  { %v416_v45 = vmul.f32 %v3706_v43, %v414_v44 }
 0x3e6   :  { %418 = vrot.lane.b32.xlu1 %v416_v45, %s3797_s12 }
 0x458   :  { %v419_v46 = vpop.permute.xlu1 %418 }
 0x459   :  { %v421_v47 = vadd.f32 %v419_v46, %v319_v38 }
 0x45b   :  { %3707 = vtanh.f32 %v421_v47 }
 0x468   :  { %v3708_v49 = vpop.eup %3707 }
 0x469   :  { %425 = vrot.lane.b32.xlu0 %v3708_v49, %s3798_s17 }
 0x4db   :  { %v426_v51 = vpop.permute.xlu0 %425 }
 0x4dc   :  { %v428_v53 = vmul.f32 %v426_v51, %v423_v50 }
 0x4de   :  { %v430_v54 = vadd.f32 %v429_v52, %v428_v53 }
 0x4e0   :  { %432 = vrot.lane.b32.xlu1 %v430_v54, %s3798_s17 }
 0x552   :  { %v433_v57 = vpop.permute.xlu1 %432 }
 0x553   :  { %436 = vst.msk [vmem:[#allocation2 + $0x8] sm:$0xff] %vm133_vm2, %v433_v57  ;;  %3414 = vmatmul.mubr.msk.f32.vlgmr.msra.gmra.mxu1 %vm133_vm2, %v433_v57 }
 0x554   :  { %3435 = vmatpush3.msra.mxu1 %v3874_v3  ;;  %3438 = vmatprep.mubr.msk.f32.mxu1 %vm3796_vm1, %v3795_v0 }
 0x555   :  { %3436 = vmatprep.subr.mxu1 %v3795_v0 }
 0x556   :  { %3437 = vmatpush3.msra.mxu1 %v3881_v4 }
 0x557   :  { %3441 = vmatprep.subr.mxu1 %v3795_v0  ;;  %3439 = vmatmul.mubr.msk.f32.vlgmr.msra.gmra.mxu1 %vm48_vm0, %v3162_v39  ;;  %v4109_v39 = vld [vmem:[%s4473_s5 + $0x10] sm:$0xff] }
 0x558   :  { %3442 = vmatpush3.msra.mxu1 %v3863_v1  ;;  %3449 = vmatprep.mubr.msk.f32.mxu1 %vm3796_vm1, %v3795_v0 }
 0x559   :  { %3443 = vmatprep.subr.mxu1 %v3795_v0 }
 0x55a   :  { %3444 = vmatpush3.msra.mxu1 %v3868_v2 }
 0x55b   :  { %3445 = vmatprep.subr.mxu1 %v3795_v0 }
 0x55c   :  { %3446 = vmatpush3.msra.mxu1 %v3887_v5 }
 0x55d   :  { %3447 = vmatprep.subr.mxu1 %v3795_v0 }
 0x55e   :  { %3448 = vmatpush3.msra.mxu1 %v3901_v7 }
 0x55f   :  { %3470 = vmatprep.subr.mxu1 %v3795_v0 }
 0x613   :  { %v600_v58 = vpop.f32.mrf.mxu1 }
 0x614   :  { %v601_v59 = vadd.f32 %v3927_v9, %v600_v58 }
 0x615   :  { %v3415_v60 = vpop.f32.mrf.mxu1 }
 0x616   :  { %612 = vrot.lane.b32.xlu0 %v601_v59, %s3797_s12  ;;  %v604_v62 = vadd.f32 %v601_v59, %v518_v61 }
 0x617   :  { %v915_v46 = vpop.f32.mrf.mxu1 }
 0x618   :  { %v3155_v63 = vmul.f32 -1.442695, %v604_v62  ;;  %v916_v52 = vadd.f32 %v3934_v14, %v915_v46  ;;  %v3168_v62 = vld [vmem:[%s4470_s0 + $0x28] sm:$0xff] }
 0x619   :  { %v3440_v47 = vpop.f32.mrf.mxu1 }
 0x61a   :  { %3709 = vpow2.f32 %v3155_v63 }
 0x627   :  { %v3710_v6 = vpop.eup %3709 }
 0x628   :  { %v608_v8 = vadd.f32 1.0, %v3710_v6 }
 0x62a   :  { %3711 = vrcp.f32 %v608_v8 }
 0x637   :  { %v3712_v10 = vpop.eup %3711 }
 0x638   :  { %v622_v18 = vsub.f32 1.0, %v3712_v10  ;;  %v628_v20 = vmul.f32 %v3712_v10, %v430_v54 }
 0x688   :  { %v613_v11 = vpop.permute.xlu0 %612 }
 0x689   :  { %v615_v12 = vmul.f32 %v3712_v10, %v613_v11 }
 0x68b   :  { %617 = vrot.lane.b32.xlu1 %v615_v12, %s3797_s12 }
 0x6fd   :  { %v618_v13 = vpop.permute.xlu1 %617 }
 0x6fe   :  { %v620_v15 = vadd.f32 %v618_v13, %v518_v61 }
 0x700   :  { %3713 = vtanh.f32 %v620_v15 }
 0x70d   :  { %v3714_v17 = vpop.eup %3713 }
 0x70e   :  { %624 = vrot.lane.b32.xlu0 %v3714_v17, %s3798_s17 }
 0x780   :  { %v625_v19 = vpop.permute.xlu0 %624 }
 0x781   :  { %v627_v21 = vmul.f32 %v625_v19, %v622_v18 }
 0x783   :  { %v629_v22 = vadd.f32 %v628_v20, %v627_v21 }
 0x785   :  { %631 = vrot.lane.b32.xlu1 %v629_v22, %s3798_s17 }
 0x7f7   :  { %v632_v25 = vpop.permute.xlu1 %631 }
 0x7f8   :  { %635 = vst.msk [vmem:[#allocation2 + $0x10] sm:$0xff] %vm133_vm2, %v632_v25  ;;  %3432 = vmatmul.mubr.msk.f32.vlgmr.msra.gmra.mxu0 %vm133_vm2, %v632_v25 }
 0x7f9   :  { %3453 = vmatpush3.msra.mxu0 %v3874_v3  ;;  %3456 = vmatprep.mubr.msk.f32.mxu0 %vm3796_vm1, %v3795_v0 }
 0x7fa   :  { %3454 = vmatprep.subr.mxu0 %v3795_v0 }
 0x7fb   :  { %3455 = vmatpush3.msra.mxu0 %v3881_v4 }
 0x7fc   :  { %3459 = vmatprep.subr.mxu0 %v3795_v0  ;;  %3457 = vmatmul.mubr.msk.f32.vlgmr.msra.gmra.mxu0 %vm48_vm0, %v3168_v62 }
 0x7fd   :  { %3460 = vmatpush3.msra.mxu0 %v3863_v1  ;;  %3467 = vmatprep.mubr.msk.f32.mxu0 %vm3796_vm1, %v3795_v0 }
 0x7fe   :  { %3461 = vmatprep.subr.mxu0 %v3795_v0 }
 0x7ff   :  { %3462 = vmatpush3.msra.mxu0 %v3868_v2 }
 0x800   :  { %3463 = vmatprep.subr.mxu0 %v3795_v0 }
 0x801   :  { %3464 = vmatpush3.msra.mxu0 %v3887_v5 }
 0x802   :  { %3465 = vmatprep.subr.mxu0 %v3795_v0 }
 0x803   :  { %3466 = vmatpush3.msra.mxu0 %v3901_v7 }
 0x804   :  { %3488 = vmatprep.subr.mxu0 %v3795_v0 }
 0x8b8   :  { %v799_v26 = vpop.f32.mrf.mxu0 }
 0x8b9   :  { %v800_v27 = vadd.f32 %v3927_v9, %v799_v26 }
 0x8ba   :  { %v3433_v28 = vpop.f32.mrf.mxu0 }
 0x8bb   :  { %811 = vrot.lane.b32.xlu0 %v800_v27, %s3797_s12  ;;  %v803_v30 = vadd.f32 %v800_v27, %v717_v29  ;;  %v3174_v28 = vld [vmem:[%s4470_s0 + $0x30] sm:$0xff] }
 0x8bc   :  { %v1114_v13 = vpop.f32.mrf.mxu0 }
 0x8bd   :  { %v3161_v31 = vmul.f32 -1.442695, %v803_v30  ;;  %v1115_v20 = vadd.f32 %v3934_v14, %v1114_v13 }
 0x8be   :  { %v3458_v15 = vpop.f32.mrf.mxu0 }
 0x8bf   :  { %3715 = vpow2.f32 %v3161_v31 }
 0x8cc   :  { %v3716_v32 = vpop.eup %3715 }
 0x8cd   :  { %v807_v33 = vadd.f32 1.0, %v3716_v32 }
 0x8cf   :  { %3717 = vrcp.f32 %v807_v33 }
 0x8dc   :  { %v3718_v34 = vpop.eup %3717 }
 0x8dd   :  { %v821_v41 = vsub.f32 1.0, %v3718_v34  ;;  %v827_v43 = vmul.f32 %v3718_v34, %v629_v22 }
 0x92d   :  { %v812_v35 = vpop.permute.xlu0 %811 }
 0x92e   :  { %v814_v36 = vmul.f32 %v3718_v34, %v812_v35 }
 0x930   :  { %816 = vrot.lane.b32.xlu1 %v814_v36, %s3797_s12 }
 0x9a2   :  { %v817_v37 = vpop.permute.xlu1 %816 }
 0x9a3   :  { %v819_v38 = vadd.f32 %v817_v37, %v717_v29  ;;  %v4102_v37 = vld [vmem:[%s4473_s5 + $0x18] sm:$0xff] }
 0x9a5   :  { %3719 = vtanh.f32 %v819_v38 }
 0x9b2   :  { %v3720_v40 = vpop.eup %3719 }
 0x9b3   :  { %823 = vrot.lane.b32.xlu0 %v3720_v40, %s3798_s17  ;;  %v4118_v40 = vld [vmem:[%s4473_s5 + $0x8] sm:$0xff] }
 0xa25   :  { %v824_v42 = vpop.permute.xlu0 %823 }
 0xa26   :  { %v826_v44 = vmul.f32 %v824_v42, %v821_v41  ;;  %v4125_v41 = vld [vmem:[%s4473_s5] sm:$0xff] }
 0xa27   :  { %v1631_v42 = vld [vmem:[#allocation2] sm:$0xff] }
 0xa28   :  { %v828_v45 = vadd.f32 %v827_v43, %v826_v44  ;;  %v1823_v43 = vld [vmem:[#allocation2 + $0x8] sm:$0xff]  ;;  %v1998_v44 = vld [vmem:[#allocation2 + $0x10] sm:$0xff] }
 0xa2a   :  { %830 = vrot.lane.b32.xlu1 %v828_v45, %s3798_s17 }
 0xa9c   :  { %v831_v48 = vpop.permute.xlu1 %830 }
 0xa9d   :  { %834 = vst.msk [vmem:[#allocation2 + $0x18] sm:$0xff] %vm133_vm2, %v831_v48  ;;  %3450 = vmatmul.mubr.msk.f32.vlgmr.msra.gmra.mxu1 %vm133_vm2, %v831_v48 }
 0xa9e   :  { %3471 = vmatpush3.msra.mxu1 %v3874_v3  ;;  %3474 = vmatprep.mubr.msk.f32.mxu1 %vm3796_vm1, %v3795_v0 }
 0xa9f   :  { %3472 = vmatprep.subr.mxu1 %v3795_v0 }
 0xaa0   :  { %3473 = vmatpush3.msra.mxu1 %v3881_v4 }
 0xaa1   :  { %3477 = vmatprep.subr.mxu1 %v3795_v0  ;;  %3475 = vmatmul.mubr.msk.f32.vlgmr.msra.gmra.mxu1 %vm48_vm0, %v3174_v28 }
 0xaa2   :  { %3478 = vmatpush3.msra.mxu1 %v3863_v1  ;;  %3485 = vmatprep.mubr.msk.f32.mxu1 %vm3796_vm1, %v3795_v0 }
 0xaa3   :  { %3479 = vmatprep.subr.mxu1 %v3795_v0 }
 0xaa4   :  { %3480 = vmatpush3.msra.mxu1 %v3868_v2 }
 0xaa5   :  { %3481 = vmatprep.subr.mxu1 %v3795_v0 }
 0xaa6   :  { %3482 = vmatpush3.msra.mxu1 %v3887_v5 }
 0xaa7   :  { %3483 = vmatprep.subr.mxu1 %v3795_v0 }
 0xaa8   :  { %3484 = vmatpush3.msra.mxu1 %v3901_v7 }
 0xaa9   :  { %3506 = vmatprep.subr.mxu1 %v3795_v0 }
 0xb5d   :  { %v998_v49 = vpop.f32.mrf.mxu1 }
 0xb5e   :  { %v999_v50 = vadd.f32 %v3927_v9, %v998_v49 }
 0xb5f   :  { %v3451_v51 = vpop.f32.mrf.mxu1 }
 0xb60   :  { %1010 = vrot.lane.b32.xlu0 %v999_v50, %s3797_s12  ;;  %v1002_v53 = vadd.f32 %v999_v50, %v916_v52 }
 0xb61   :  { %v4097_v35 = vpop.f32.mrf.mxu1 }
 0xb62   :  { %v3167_v54 = vmul.f32 -1.442695, %v1002_v53  ;;  %v1314_v62 = vadd.f32 %v3934_v14, %v4097_v35 }
 0xb63   :  { %v3476_v36 = vpop.f32.mrf.mxu1 }
 0xb64   :  { %3721 = vpow2.f32 %v3167_v54 }
 0xb71   :  { %v3722_v55 = vpop.eup %3721 }
 0xb72   :  { %v1006_v56 = vadd.f32 1.0, %v3722_v55 }
 0xb74   :  { %3723 = vrcp.f32 %v1006_v56 }
 0xb81   :  { %v3724_v57 = vpop.eup %3723 }
 0xb82   :  { %v1020_v6 = vsub.f32 1.0, %v3724_v57  ;;  %v1026_v10 = vmul.f32 %v3724_v57, %v828_v45  ;;  %v2173_v45 = vld [vmem:[#allocation2 + $0x18] sm:$0xff] }
 0xbd2   :  { %v1011_v58 = vpop.permute.xlu0 %1010 }
 0xbd3   :  { %v1013_v59 = vmul.f32 %v3724_v57, %v1011_v58 }
 0xbd5   :  { %1015 = vrot.lane.b32.xlu1 %v1013_v59, %s3797_s12 }
 0xc47   :  { %v1016_v60 = vpop.permute.xlu1 %1015 }
 0xc48   :  { %v1018_v61 = vadd.f32 %v1016_v60, %v916_v52 }
 0xc4a   :  { %3725 = vtanh.f32 %v1018_v61 }
 0xc57   :  { %v3726_v63 = vpop.eup %3725 }
 0xc58   :  { %1022 = vrot.lane.b32.xlu0 %v3726_v63, %s3798_s17 }
 0xcca   :  { %v1023_v8 = vpop.permute.xlu0 %1022 }
 0xccb   :  { %v1025_v11 = vmul.f32 %v1023_v8, %v1020_v6 }
 0xccd   :  { %v1027_v12 = vadd.f32 %v1026_v10, %v1025_v11 }
 0xccf   :  { %1029 = vrot.lane.b32.xlu1 %v1027_v12, %s3798_s17 }
 0xd41   :  { %v1030_v16 = vpop.permute.xlu1 %1029 }
 0xd42   :  { %1033 = vst.msk [vmem:[#allocation2 + $0x20] sm:$0xff] %vm133_vm2, %v1030_v16  ;;  %3468 = vmatmul.mubr.msk.f32.vlgmr.msra.gmra.mxu0 %vm133_vm2, %v1030_v16 }
 0xd43   :  { %3489 = vmatpush3.msra.mxu0 %v3874_v3  ;;  %3492 = vmatprep.mubr.msk.f32.mxu0 %vm3796_vm1, %v3795_v0 }
 0xd44   :  { %3490 = vmatprep.subr.mxu0 %v3795_v0 }
 0xd45   :  { %3491 = vmatpush3.msra.mxu0 %v3881_v4 }
 0xd46   :  { %3495 = vmatprep.subr.mxu0 %v3795_v0 }
 0xd49   :  { %v2348_v46 = vld [vmem:[#allocation2 + $0x20] sm:$0xff] }
 0xe02   :  { %v1197_v17 = vpop.f32.mrf.mxu0 }
 0xe03   :  { %v1198_v18 = vadd.f32 %v3927_v9, %v1197_v17  ;;  %v3180_v17 = vld [vmem:[%s4470_s0 + $0x38] sm:$0xff] }
 0xe04   :  { %v3469_v19 = vpop.f32.mrf.mxu0  ;;  %3493 = vmatmul.mubr.msk.f32.vlgmr.msra.gmra.mxu0 %vm48_vm0, %v3180_v17 }
 0xe05   :  { %1209 = vrot.lane.b32.xlu0 %v1198_v18, %s3797_s12  ;;  %v1201_v21 = vadd.f32 %v1198_v18, %v1115_v20  ;;  %3496 = vmatpush3.msra.mxu0 %v3863_v1 }
 0xe06   :  { %3503 = vmatprep.mubr.msk.f32.mxu0 %vm3796_vm1, %v3795_v0  ;;  %3497 = vmatprep.subr.mxu0 %v3795_v0 }
 0xe07   :  { %v3173_v22 = vmul.f32 -1.442695, %v1201_v21  ;;  %3498 = vmatpush3.msra.mxu0 %v3868_v2 }
 0xe08   :  { %3499 = vmatprep.subr.mxu0 %v3795_v0 }
 0xe09   :  { %3727 = vpow2.f32 %v3173_v22  ;;  %3500 = vmatpush3.msra.mxu0 %v3887_v5 }
 0xe0a   :  { %3501 = vmatprep.subr.mxu0 %v3795_v0 }
 0xe0b   :  { %3502 = vmatpush3.msra.mxu0 %v3901_v7  ;;  %v4239_v7 = vld [vmem:[%s4474_s6 + $0x18] sm:$0xff] }
 0xe0c   :  { %3517 = vmatprep.subr.mxu0 %v3795_v0 }
 0xe16   :  { %v3728_v3 = vpop.eup %3727 }
 0xe17   :  { %v1205_v23 = vadd.f32 1.0, %v3728_v3  ;;  %v4246_v3 = vld [vmem:[%s4474_s6 + $0x10] sm:$0xff] }
 0xe19   :  { %3729 = vrcp.f32 %v1205_v23  ;;  %v4255_v23 = vld [vmem:[%s4474_s6 + $0x8] sm:$0xff] }
 0xe26   :  { %v3730_v24 = vpop.eup %3729 }
 0xe27   :  { %v1219_v30 = vsub.f32 1.0, %v3730_v24  ;;  %v1225_v32 = vmul.f32 %v3730_v24, %v1027_v12 }
 0xe77   :  { %v1210_v25 = vpop.permute.xlu0 %1209 }
 0xe78   :  { %v1212_v26 = vmul.f32 %v3730_v24, %v1210_v25  ;;  %v4262_v24 = vld [vmem:[%s4474_s6] sm:$0xff] }
 0xe7a   :  { %1214 = vrot.lane.b32.xlu1 %v1212_v26, %s3797_s12 }
 0xec4   :  { %v4234_v2 = vpop.f32.mrf.mxu0 }
 0xec6   :  { %v3494_v5 = vpop.f32.mrf.mxu0 }
 0xeec   :  { %v1215_v4 = vpop.permute.xlu1 %1214 }
 0xeed   :  { %v1217_v27 = vadd.f32 %v1215_v4, %v1115_v20 }
 0xeef   :  { %3731 = vtanh.f32 %v1217_v27  ;;  %v4295_v27 = vld [vmem:[%s4475_s8] ss:$0 sm:$0xff] }
 0xefc   :  { %v3732_v29 = vpop.eup %3731 }
 0xefd   :  { %1221 = vrot.lane.b32.xlu0 %v3732_v29, %s3798_s17 }
 0xf6f   :  { %v1222_v31 = vpop.permute.xlu0 %1221 }
 0xf70   :  { %v1224_v33 = vmul.f32 %v1222_v31, %v1219_v30 }
 0xf72   :  { %v4093_v34 = vadd.f32 %v1225_v32, %v1224_v33  ;;  %v4304_v33 = vld [vmem:[%s4476_s7] ss:$0 sm:$0xff] }
 0xf74   :  { %1228 = vrot.lane.b32.xlu1 %v4093_v34, %s3798_s17 }
 0xfe6   :  { %v1229_v38 = vpop.permute.xlu1 %1228 }
 0xfe7   :  { %1232 = vst.msk [vmem:[#allocation2 + $0x28] sm:$0xff] %vm133_vm2, %v1229_v38  ;;  %3486 = vmatmul.mubr.msk.f32.vlgmr.msra.gmra.mxu1 %vm133_vm2, %v1229_v38 }
 0xfe8   :  { %3507 = vmatpush3.msra.mxu1 %v4102_v37  ;;  %3514 = vmatprep.mubr.msk.f32.mxu1 %vm3796_vm1, %v3795_v0 }
 0xfe9   :  { %3508 = vmatprep.subr.mxu1 %v3795_v0 }
 0xfea   :  { %3509 = vmatpush3.msra.mxu1 %v4109_v39 }
 0xfeb   :  { %3510 = vmatprep.subr.mxu1 %v3795_v0 }
 0xfec   :  { %3511 = vmatpush3.msra.mxu1 %v4118_v40 }
 0xfed   :  { %3512 = vmatprep.subr.mxu1 %v3795_v0 }
 0xfee   :  { %3513 = vmatpush3.msra.mxu1 %v4125_v41  ;;  %v2523_v47 = vld [vmem:[#allocation2 + $0x28] sm:$0xff] }
 0xfef   :  { %3515 = vmatmul.mubr.msk.f32.vlgmr.msra.gmra.mxu1 %vm133_vm2, %v1631_v42  ;;  %3528 = vmatprep.subr.mxu1 %v3795_v0 }
 0xff0   :  { %3529 = vmatpush3.msra.mxu1 %v4102_v37  ;;  %3536 = vmatprep.mubr.msk.f32.mxu1 %vm3796_vm1, %v3795_v0 }
 0xff1   :  { %3530 = vmatprep.subr.mxu1 %v3795_v0 }
 0xff2   :  { %3531 = vmatpush3.msra.mxu1 %v4109_v39 }
 0xff3   :  { %3532 = vmatprep.subr.mxu1 %v3795_v0 }
 0xff4   :  { %3533 = vmatpush3.msra.mxu1 %v4118_v40 }
 0xff5   :  { %3534 = vmatprep.subr.mxu1 %v3795_v0 }
 0xff6   :  { %3535 = vmatpush3.msra.mxu1 %v4125_v41 }
 0xff7   :  { %3537 = vmatmul.mubr.msk.f32.vlgmr.msra.gmra.mxu1 %vm133_vm2, %v1823_v43  ;;  %3550 = vmatprep.subr.mxu1 %v3795_v0 }
 0xff8   :  { %3551 = vmatpush3.msra.mxu1 %v4102_v37  ;;  %3558 = vmatprep.mubr.msk.f32.mxu1 %vm3796_vm1, %v3795_v0 }
 0xff9   :  { %3552 = vmatprep.subr.mxu1 %v3795_v0 }
 0xffa   :  { %3553 = vmatpush3.msra.mxu1 %v4109_v39 }
 0xffb   :  { %3554 = vmatprep.subr.mxu1 %v3795_v0 }
 0xffc   :  { %3555 = vmatpush3.msra.mxu1 %v4118_v40 }
 0xffd   :  { %3556 = vmatprep.subr.mxu1 %v3795_v0 }
 0xffe   :  { %3557 = vmatpush3.msra.mxu1 %v4125_v41 }
 0xfff   :  { %3559 = vmatmul.mubr.msk.f32.vlgmr.msra.gmra.mxu1 %vm133_vm2, %v1998_v44  ;;  %3572 = vmatprep.subr.mxu1 %v3795_v0 }
0x1000   :  { %3573 = vmatpush3.msra.mxu1 %v4102_v37  ;;  %3580 = vmatprep.mubr.msk.f32.mxu1 %vm3796_vm1, %v3795_v0 }
0x1001   :  { %3574 = vmatprep.subr.mxu1 %v3795_v0 }
0x1002   :  { %3575 = vmatpush3.msra.mxu1 %v4109_v39 }
0x1003   :  { %3576 = vmatprep.subr.mxu1 %v3795_v0 }
0x1004   :  { %3577 = vmatpush3.msra.mxu1 %v4118_v40 }
0x1005   :  { %3578 = vmatprep.subr.mxu1 %v3795_v0 }
0x1006   :  { %3579 = vmatpush3.msra.mxu1 %v4125_v41 }
0x1007   :  { %3581 = vmatmul.mubr.msk.f32.vlgmr.msra.gmra.mxu1 %vm133_vm2, %v2173_v45  ;;  %3594 = vmatprep.subr.mxu1 %v3795_v0 }
0x1008   :  { %3595 = vmatpush3.msra.mxu1 %v4102_v37  ;;  %3602 = vmatprep.mubr.msk.f32.mxu1 %vm3796_vm1, %v3795_v0 }
0x1009   :  { %3596 = vmatprep.subr.mxu1 %v3795_v0 }
0x100a   :  { %3597 = vmatpush3.msra.mxu1 %v4109_v39 }
0x100b   :  { %3598 = vmatprep.subr.mxu1 %v3795_v0 }
0x100c   :  { %3599 = vmatpush3.msra.mxu1 %v4118_v40 }
0x100d   :  { %3600 = vmatprep.subr.mxu1 %v3795_v0 }
0x100e   :  { %3601 = vmatpush3.msra.mxu1 %v4125_v41 }
0x100f   :  { %3603 = vmatmul.mubr.msk.f32.vlgmr.msra.gmra.mxu1 %vm133_vm2, %v2348_v46  ;;  %3616 = vmatprep.subr.mxu1 %v3795_v0 }
0x1010   :  { %3617 = vmatpush3.msra.mxu1 %v4102_v37  ;;  %3624 = vmatprep.mubr.msk.f32.mxu1 %vm3796_vm1, %v3795_v0 }
0x1011   :  { %3618 = vmatprep.subr.mxu1 %v3795_v0 }
0x1012   :  { %3619 = vmatpush3.msra.mxu1 %v4109_v39 }
0x1013   :  { %3620 = vmatprep.subr.mxu1 %v3795_v0 }
0x1014   :  { %3621 = vmatpush3.msra.mxu1 %v4118_v40 }
0x1015   :  { %3622 = vmatprep.subr.mxu1 %v3795_v0 }
0x1016   :  { %3623 = vmatpush3.msra.mxu1 %v4125_v41 }
0x1017   :  { %3625 = vmatmul.mubr.msk.f32.vlgmr.msra.gmra.mxu1 %vm133_vm2, %v2523_v47  ;;  %3638 = vmatprep.subr.mxu1 %v3795_v0 }
0x1018   :  { %3639 = vmatpush3.msra.mxu1 %v4102_v37  ;;  %3646 = vmatprep.mubr.msk.f32.mxu1 %vm3796_vm1, %v3795_v0 }
0x1019   :  { %3640 = vmatprep.subr.mxu1 %v3795_v0 }
0x101a   :  { %3641 = vmatpush3.msra.mxu1 %v4109_v39 }
0x101b   :  { %3642 = vmatprep.subr.mxu1 %v3795_v0 }
0x101c   :  { %3643 = vmatpush3.msra.mxu1 %v4118_v40 }
0x101d   :  { %3644 = vmatprep.subr.mxu1 %v3795_v0 }
0x101e   :  { %3645 = vmatpush3.msra.mxu1 %v4125_v41 }
0x101f   :  { %3660 = vmatprep.subr.mxu1 %v3795_v0 }
0x10a7   :  { %v1396_v48 = vpop.f32.mrf.mxu1 }
0x10a8   :  { %v1397_v49 = vadd.f32 %v3927_v9, %v1396_v48 }
0x10a9   :  { %v3487_v50 = vpop.f32.mrf.mxu1 }
0x10aa   :  { %1408 = vrot.lane.b32.xlu0 %v1397_v49, %s3797_s12  ;;  %v1400_v63 = vadd.f32 %v1397_v49, %v1314_v62 }
0x10ac   :  { %v3179_v6 = vmul.f32 -1.442695, %v1400_v63 }
0x10ae   :  { %3733 = vpow2.f32 %v3179_v6 }
0x10af   :  { %v4199_v51 = vpop.f32.mrf.mxu1 }
0x10b1   :  { %v3516_v52 = vpop.f32.mrf.mxu1 }
0x10b7   :  { %v4201_v53 = vpop.f32.mrf.mxu1 }
0x10b9   :  { %v3538_v54 = vpop.f32.mrf.mxu1 }
0x10bb   :  { %v3734_v8 = vpop.eup %3733 }
0x10bc   :  { %v1404_v10 = vadd.f32 1.0, %v3734_v8 }
0x10be   :  { %3735 = vrcp.f32 %v1404_v10 }
0x10bf   :  { %v4203_v55 = vpop.f32.mrf.mxu1 }
0x10c1   :  { %v3560_v56 = vpop.f32.mrf.mxu1 }
0x10c2   :  { %v1894_v56 = vadd.f32 %v4304_v33, %v4201_v53 }
0x10c7   :  { %v4205_v57 = vpop.f32.mrf.mxu1 }
0x10c9   :  { %v3582_v58 = vpop.f32.mrf.mxu1 }
0x10cb   :  { %v3736_v11 = vpop.eup %3735 }
0x10cc   :  { %v1418_v1 = vsub.f32 1.0, %v3736_v11  ;;  %v1424_v19 = vmul.f32 %v3736_v11, %v4093_v34  ;;  %v1713_v34 = vadd.f32 %v4304_v33, %v4199_v51 }
0x10cf   :  { %v4207_v59 = vpop.f32.mrf.mxu1 }
0x10d1   :  { %v3604_v60 = vpop.f32.mrf.mxu1 }
0x10d7   :  { %v4209_v61 = vpop.f32.mrf.mxu1 }
0x10d9   :  { %v3626_v9 = vpop.f32.mrf.mxu1 }
0x111c   :  { %v1409_v12 = vpop.permute.xlu0 %1408 }
0x111d   :  { %v1411_v13 = vmul.f32 %v3736_v11, %v1409_v12 }
0x111f   :  { %1413 = vrot.lane.b32.xlu1 %v1411_v13, %s3797_s12 }
0x1191   :  { %v1414_v15 = vpop.permute.xlu1 %1413 }
0x1192   :  { %v1416_v16 = vadd.f32 %v1414_v15, %v1314_v62 }
0x1194   :  { %3737 = vtanh.f32 %v1416_v16 }
0x11a1   :  { %v3738_v14 = vpop.eup %3737 }
0x11a2   :  { %1420 = vrot.lane.b32.xlu0 %v3738_v14, %s3798_s17 }
0x1214   :  { %v1421_v18 = vpop.permute.xlu0 %1420 }
0x1215   :  { %v1423_v20 = vmul.f32 %v1421_v18, %v1418_v1 }
0x1217   :  { %v4230_v21 = vadd.f32 %v1424_v19, %v1423_v20  ;;  %v2069_v20 = vadd.f32 %v4304_v33, %v4203_v55 }
0x1219   :  { %1427 = vrot.lane.b32.xlu1 %v4230_v21, %s3798_s17 }
0x128b   :  { %v1428_v22 = vpop.permute.xlu1 %1427 }
0x128c   :  { %1431 = vst.msk [vmem:[#allocation2 + $0x30] sm:$0xff] %vm133_vm2, %v1428_v22  ;;  %3504 = vmatmul.mubr.msk.f32.vlgmr.msra.gmra.mxu0 %vm133_vm2, %v1428_v22 }
0x128d   :  { %3518 = vmatpush3.msra.mxu0 %v4239_v7  ;;  %3525 = vmatprep.mubr.msk.f32.mxu0 %vm3796_vm1, %v3795_v0 }
0x128e   :  { %3519 = vmatprep.subr.mxu0 %v3795_v0 }
0x128f   :  { %3520 = vmatpush3.msra.mxu0 %v4246_v3 }
0x1290   :  { %3521 = vmatprep.subr.mxu0 %v3795_v0 }
0x1291   :  { %3522 = vmatpush3.msra.mxu0 %v4255_v23 }
0x1292   :  { %3523 = vmatprep.subr.mxu0 %v3795_v0 }
0x1293   :  { %3524 = vmatpush3.msra.mxu0 %v4262_v24  ;;  %v2698_v25 = vld [vmem:[#allocation2 + $0x30] sm:$0xff] }
0x1294   :  { %3526 = vmatmul.mubr.f32.vlgmr.msra.gmra.mxu0 %v3795_v0  ;;  %3647 = vmatmul.mubr.msk.f32.vlgmr.msra.gmra.mxu1 %vm133_vm2, %v2698_v25 }
0x1295   :  { %3539 = vmatprep.subr.mxu0 %v3795_v0  ;;  %3547 = vmatprep.mubr.msk.f32.mxu0 %vm3796_vm1, %v3795_v0 }
0x1296   :  { %3540 = vmatpush3.msra.mxu0 %v4239_v7  ;;  %3661 = vmatpush3.msra.mxu1 %v4102_v37 }
0x1297   :  { %3541 = vmatprep.subr.mxu0 %v3795_v0  ;;  %3662 = vmatprep.subr.mxu1 %v3795_v0 }
0x1298   :  { %3542 = vmatpush3.msra.mxu0 %v4246_v3  ;;  %3663 = vmatpush3.msra.mxu1 %v4109_v39 }
0x1299   :  { %3543 = vmatprep.subr.mxu0 %v3795_v0  ;;  %3664 = vmatprep.subr.mxu1 %v3795_v0 }
0x129a   :  { %3544 = vmatpush3.msra.mxu0 %v4255_v23  ;;  %3665 = vmatpush3.msra.mxu1 %v4118_v40 }
0x129b   :  { %3545 = vmatprep.subr.mxu0 %v3795_v0  ;;  %3666 = vmatprep.subr.mxu1 %v3795_v0 }
0x129c   :  { %3546 = vmatpush3.msra.mxu0 %v4262_v24  ;;  %3667 = vmatpush3.msra.mxu1 %v4125_v41 }
0x129d   :  { %3561 = vmatprep.subr.mxu0 %v3795_v0  ;;  %3668 = vmatprep.mubr.msk.f32.mxu1 %vm3796_vm1, %v3795_v0 }
0x129e   :  { %3682 = vmatprep.subr.mxu1 %v3795_v0 }
0x134c   :  { %v4290_v26 = vpop.f32.mrf.mxu0 }
0x134e   :  { %v3505_v4 = vpop.f32.mrf.mxu0 }
0x1354   :  { %v1793_v28 = vpop.f32.mrf.mxu0  ;;  %v4297_v29 = vpop.f32.mrf.mxu1 }
0x1355   :  { %v1794_v30 = vadd.f32 %v4295_v27, %v1793_v28 }
0x1356   :  { %v3527_v31 = vpop.f32.mrf.mxu0  ;;  %v3648_v32 = vpop.f32.mrf.mxu1 }
0x1357   :  { %1805 = vrot.lane.b32.xlu0 %v1794_v30, %s3797_s12  ;;  %v1797_v35 = vadd.f32 %v1794_v30, %v1713_v34 }
0x1359   :  { %v3189_v36 = vmul.f32 -1.442695, %v1797_v35 }
0x135b   :  { %3739 = vpow2.f32 %v3189_v36 }
0x1368   :  { %v3740_v37 = vpop.eup %3739 }
0x1369   :  { %v1801_v38 = vadd.f32 1.0, %v3740_v37 }
0x136b   :  { %3741 = vrcp.f32 %v1801_v38 }
0x1378   :  { %v3742_v39 = vpop.eup %3741 }
0x1379   :  { %v1815_v45 = vsub.f32 1.0, %v3742_v39  ;;  %v1821_v47 = vmul.f32 0.0, %v3742_v39 }
0x13c9   :  { %v1806_v40 = vpop.permute.xlu0 %1805 }
0x13ca   :  { %v1808_v41 = vmul.f32 %v3742_v39, %v1806_v40 }
0x13cc   :  { %1810 = vrot.lane.b32.xlu1 %v1808_v41, %s3797_s12 }
0x143e   :  { %v1811_v42 = vpop.permute.xlu1 %1810 }
0x143f   :  { %v1813_v43 = vadd.f32 %v1811_v42, %v1713_v34 }
0x1441   :  { %3743 = vtanh.f32 %v1813_v43 }
0x144e   :  { %v3744_v44 = vpop.eup %3743 }
0x144f   :  { %1817 = vrot.lane.b32.xlu0 %v3744_v44, %s3798_s17  ;;  %v2244_v44 = vadd.f32 %v4304_v33, %v4205_v57 }
0x14c1   :  { %v1818_v46 = vpop.permute.xlu0 %1817 }
0x14c2   :  { %v1820_v48 = vmul.f32 %v1818_v46, %v1815_v45 }
0x14c4   :  { %v1822_v49 = vadd.f32 %v1821_v47, %v1820_v48 }
0x14c6   :  { %1898 = vrot.lane.b32.xlu1 %v1822_v49, %s3798_s17 }
0x1538   :  { %v1899_v50 = vpop.permute.xlu1 %1898 }
0x1539   :  { %3548 = vmatmul.mubr.msk.f32.vlgmr.msra.gmra.mxu0 %vm133_vm2, %v1899_v50 }
0x153a   :  { %3562 = vmatpush3.msra.mxu0 %v4239_v7  ;;  %3569 = vmatprep.mubr.msk.f32.mxu0 %vm3796_vm1, %v3795_v0 }
0x153b   :  { %3563 = vmatprep.subr.mxu0 %v3795_v0 }
0x153c   :  { %3564 = vmatpush3.msra.mxu0 %v4246_v3 }
0x153d   :  { %3565 = vmatprep.subr.mxu0 %v3795_v0 }
0x153e   :  { %3566 = vmatpush3.msra.mxu0 %v4255_v23 }
0x153f   :  { %3567 = vmatprep.subr.mxu0 %v3795_v0 }
0x1540   :  { %3568 = vmatpush3.msra.mxu0 %v4262_v24 }
0x1541   :  { %3583 = vmatprep.subr.mxu0 %v3795_v0 }
0x15f9   :  { %v1968_v51 = vpop.f32.mrf.mxu0 }
0x15fa   :  { %v1969_v52 = vadd.f32 %v4295_v27, %v1968_v51 }
0x15fb   :  { %v3549_v54 = vpop.f32.mrf.mxu0 }
0x15fc   :  { %1980 = vrot.lane.b32.xlu0 %v1969_v52, %s3797_s12  ;;  %v1972_v58 = vadd.f32 %v1969_v52, %v1894_v56 }
0x15fe   :  { %v3192_v60 = vmul.f32 -1.442695, %v1972_v58 }
0x1600   :  { %3745 = vpow2.f32 %v3192_v60 }
0x160d   :  { %v3746_v9 = vpop.eup %3745 }
0x160e   :  { %v1976_v62 = vadd.f32 1.0, %v3746_v9 }
0x1610   :  { %3747 = vrcp.f32 %v1976_v62 }
0x161d   :  { %v3748_v63 = vpop.eup %3747 }
0x161e   :  { %v1990_v13 = vsub.f32 1.0, %v3748_v63  ;;  %v1996_v53 = vmul.f32 %v3748_v63, %v1822_v49 }
0x166e   :  { %v1981_v6 = vpop.permute.xlu0 %1980 }
0x166f   :  { %v1983_v8 = vmul.f32 %v3748_v63, %v1981_v6 }
0x1671   :  { %1985 = vrot.lane.b32.xlu1 %v1983_v8, %s3797_s12 }
0x16e3   :  { %v1986_v10 = vpop.permute.xlu1 %1985 }
0x16e4   :  { %v1988_v11 = vadd.f32 %v1986_v10, %v1894_v56 }
0x16e6   :  { %3749 = vtanh.f32 %v1988_v11  ;;  %v2419_v11 = vadd.f32 %v4304_v33, %v4207_v59 }
0x16f3   :  { %v3750_v12 = vpop.eup %3749 }
0x16f4   :  { %1992 = vrot.lane.b32.xlu0 %v3750_v12, %s3798_s17 }
0x1766   :  { %v1993_v15 = vpop.permute.xlu0 %1992 }
0x1767   :  { %v1995_v16 = vmul.f32 %v1993_v15, %v1990_v13 }
0x1769   :  { %v1997_v17 = vadd.f32 %v1996_v53, %v1995_v16 }
0x176b   :  { %2073 = vrot.lane.b32.xlu1 %v1997_v17, %s3798_s17 }
0x17dd   :  { %v2074_v14 = vpop.permute.xlu1 %2073 }
0x17de   :  { %3570 = vmatmul.mubr.msk.f32.vlgmr.msra.gmra.mxu0 %vm133_vm2, %v2074_v14 }
0x17df   :  { %3584 = vmatpush3.msra.mxu0 %v4239_v7  ;;  %3591 = vmatprep.mubr.msk.f32.mxu0 %vm3796_vm1, %v3795_v0 }
0x17e0   :  { %3585 = vmatprep.subr.mxu0 %v3795_v0 }
0x17e1   :  { %3586 = vmatpush3.msra.mxu0 %v4246_v3 }
0x17e2   :  { %3587 = vmatprep.subr.mxu0 %v3795_v0 }
0x17e3   :  { %3588 = vmatpush3.msra.mxu0 %v4255_v23 }
0x17e4   :  { %3589 = vmatprep.subr.mxu0 %v3795_v0 }
0x17e5   :  { %3590 = vmatpush3.msra.mxu0 %v4262_v24 }
0x17e6   :  { %3605 = vmatprep.subr.mxu0 %v3795_v0 }
0x189e   :  { %v2143_v1 = vpop.f32.mrf.mxu0 }
0x189f   :  { %v2144_v18 = vadd.f32 %v4295_v27, %v2143_v1 }
0x18a0   :  { %v3571_v19 = vpop.f32.mrf.mxu0 }
0x18a1   :  { %2155 = vrot.lane.b32.xlu0 %v2144_v18, %s3797_s12  ;;  %v2147_v5 = vadd.f32 %v2144_v18, %v2069_v20 }
0x18a3   :  { %v3195_v22 = vmul.f32 -1.442695, %v2147_v5 }
0x18a5   :  { %3751 = vpow2.f32 %v3195_v22 }
0x18b2   :  { %v3752_v25 = vpop.eup %3751 }
0x18b3   :  { %v2151_v4 = vadd.f32 1.0, %v3752_v25 }
0x18b5   :  { %3753 = vrcp.f32 %v2151_v4 }
0x18c2   :  { %v3754_v28 = vpop.eup %3753 }
0x18c3   :  { %v2165_v36 = vsub.f32 1.0, %v3754_v28  ;;  %v2171_v55 = vmul.f32 %v3754_v28, %v1997_v17 }
0x1913   :  { %v2156_v30 = vpop.permute.xlu0 %2155 }
0x1914   :  { %v2158_v31 = vmul.f32 %v3754_v28, %v2156_v30 }
0x1916   :  { %2160 = vrot.lane.b32.xlu1 %v2158_v31, %s3797_s12 }
0x1988   :  { %v2161_v32 = vpop.permute.xlu1 %2160 }
0x1989   :  { %v2163_v34 = vadd.f32 %v2161_v32, %v2069_v20  ;;  %v2594_v32 = vadd.f32 %v4304_v33, %v4209_v61 }
0x198b   :  { %3755 = vtanh.f32 %v2163_v34 }
0x1998   :  { %v3756_v35 = vpop.eup %3755 }
0x1999   :  { %2167 = vrot.lane.b32.xlu0 %v3756_v35, %s3798_s17 }
0x1a0b   :  { %v2168_v37 = vpop.permute.xlu0 %2167 }
0x1a0c   :  { %v2170_v38 = vmul.f32 %v2168_v37, %v2165_v36 }
0x1a0e   :  { %v2172_v39 = vadd.f32 %v2171_v55, %v2170_v38 }
0x1a10   :  { %2248 = vrot.lane.b32.xlu1 %v2172_v39, %s3798_s17 }
0x1a82   :  { %v2249_v40 = vpop.permute.xlu1 %2248 }
0x1a83   :  { %3592 = vmatmul.mubr.msk.f32.vlgmr.msra.gmra.mxu0 %vm133_vm2, %v2249_v40 }
0x1a84   :  { %3606 = vmatpush3.msra.mxu0 %v4239_v7  ;;  %3613 = vmatprep.mubr.msk.f32.mxu0 %vm3796_vm1, %v3795_v0 }
0x1a85   :  { %3607 = vmatprep.subr.mxu0 %v3795_v0 }
0x1a86   :  { %3608 = vmatpush3.msra.mxu0 %v4246_v3 }
0x1a87   :  { %3609 = vmatprep.subr.mxu0 %v3795_v0 }
0x1a88   :  { %3610 = vmatpush3.msra.mxu0 %v4255_v23 }
0x1a89   :  { %3611 = vmatprep.subr.mxu0 %v3795_v0 }
0x1a8a   :  { %3612 = vmatpush3.msra.mxu0 %v4262_v24 }
0x1a8b   :  { %3627 = vmatprep.subr.mxu0 %v3795_v0 }
0x1b43   :  { %v2318_v41 = vpop.f32.mrf.mxu0 }
0x1b44   :  { %v2319_v42 = vadd.f32 %v4295_v27, %v2318_v41 }
0x1b45   :  { %v3593_v43 = vpop.f32.mrf.mxu0 }
0x1b46   :  { %2330 = vrot.lane.b32.xlu0 %v2319_v42, %s3797_s12  ;;  %v2322_v45 = vadd.f32 %v2319_v42, %v2244_v44 }
0x1b48   :  { %v3198_v46 = vmul.f32 -1.442695, %v2322_v45 }
0x1b4a   :  { %3757 = vpow2.f32 %v3198_v46 }
0x1b57   :  { %v3758_v47 = vpop.eup %3757 }
0x1b58   :  { %v2326_v48 = vadd.f32 1.0, %v3758_v47  ;;  %v3793_v47 = vld [vmem:[%s4471_s4] ss:$0 sm:$0xff] }
0x1b5a   :  { %3759 = vrcp.f32 %v2326_v48  ;;  %v1596_v48 = vadd.f32 %v3793_v47, %v4290_v26 }
0x1b67   :  { %v3760_v49 = vpop.eup %3759 }
0x1b68   :  { %v2340_v58 = vsub.f32 1.0, %v3760_v49  ;;  %v2346_v57 = vmul.f32 %v3760_v49, %v2172_v39 }
0x1bb8   :  { %v2331_v50 = vpop.permute.xlu0 %2330 }
0x1bb9   :  { %v2333_v51 = vmul.f32 %v3760_v49, %v2331_v50  ;;  %v3794_v49 = vld [vmem:[%s4472_s3] ss:$0 sm:$0xff] }
0x1bba   :  { %v1513_v50 = vadd.f32 %v3794_v49, %v4234_v2 }
0x1bbb   :  { %2335 = vrot.lane.b32.xlu1 %v2333_v51, %s3797_s12 }
0x1bbc   :  { %v1599_v51 = vadd.f32 %v1596_v48, %v1513_v50 }
0x1c2d   :  { %v2336_v52 = vpop.permute.xlu1 %2335 }
0x1c2e   :  { %v2338_v54 = vadd.f32 %v2336_v52, %v2244_v44  ;;  %v3185_v52 = vmul.f32 -1.442695, %v1599_v51 }
0x1c30   :  { %3761 = vtanh.f32 %v2338_v54 }
0x1c3d   :  { %v3762_v56 = vpop.eup %3761 }
0x1c3e   :  { %2342 = vrot.lane.b32.xlu0 %v3762_v56, %s3798_s17 }
0x1cb0   :  { %v2343_v60 = vpop.permute.xlu0 %2342 }
0x1cb1   :  { %v2345_v9 = vmul.f32 %v2343_v60, %v2340_v58 }
0x1cb3   :  { %v2347_v62 = vadd.f32 %v2346_v57, %v2345_v9 }
0x1cb5   :  { %2423 = vrot.lane.b32.xlu1 %v2347_v62, %s3798_s17 }
0x1d27   :  { %v2424_v63 = vpop.permute.xlu1 %2423 }
0x1d28   :  { %3614 = vmatmul.mubr.msk.f32.vlgmr.msra.gmra.mxu0 %vm133_vm2, %v2424_v63 }
0x1d29   :  { %3628 = vmatpush3.msra.mxu0 %v4239_v7  ;;  %3635 = vmatprep.mubr.msk.f32.mxu0 %vm3796_vm1, %v3795_v0 }
0x1d2a   :  { %3629 = vmatprep.subr.mxu0 %v3795_v0 }
0x1d2b   :  { %3630 = vmatpush3.msra.mxu0 %v4246_v3 }
0x1d2c   :  { %3631 = vmatprep.subr.mxu0 %v3795_v0 }
0x1d2d   :  { %3632 = vmatpush3.msra.mxu0 %v4255_v23 }
0x1d2e   :  { %3633 = vmatprep.subr.mxu0 %v3795_v0 }
0x1d2f   :  { %3634 = vmatpush3.msra.mxu0 %v4262_v24 }
0x1d30   :  { %3649 = vmatprep.subr.mxu0 %v3795_v0 }
0x1de8   :  { %v2493_v6 = vpop.f32.mrf.mxu0 }
0x1de9   :  { %v2494_v8 = vadd.f32 %v4295_v27, %v2493_v6 }
0x1dea   :  { %v3615_v10 = vpop.f32.mrf.mxu0 }
0x1deb   :  { %2505 = vrot.lane.b32.xlu0 %v2494_v8, %s3797_s12  ;;  %v2497_v12 = vadd.f32 %v2494_v8, %v2419_v11 }
0x1ded   :  { %v3201_v13 = vmul.f32 -1.442695, %v2497_v12 }
0x1def   :  { %3763 = vpow2.f32 %v3201_v13 }
0x1dfc   :  { %v3764_v15 = vpop.eup %3763 }
0x1dfd   :  { %v2501_v53 = vadd.f32 1.0, %v3764_v15 }
0x1dff   :  { %3765 = vrcp.f32 %v2501_v53 }
0x1e0c   :  { %v3766_v16 = vpop.eup %3765 }
0x1e0d   :  { %v2515_v20 = vsub.f32 1.0, %v3766_v16  ;;  %v2521_v59 = vmul.f32 %v3766_v16, %v2347_v62 }
0x1e5d   :  { %v2506_v17 = vpop.permute.xlu0 %2505 }
0x1e5e   :  { %v2508_v14 = vmul.f32 %v3766_v16, %v2506_v17 }
0x1e60   :  { %2510 = vrot.lane.b32.xlu1 %v2508_v14, %s3797_s12 }
0x1ed2   :  { %v2511_v1 = vpop.permute.xlu1 %2510 }
0x1ed3   :  { %v2513_v18 = vadd.f32 %v2511_v1, %v2419_v11 }
0x1ed5   :  { %3767 = vtanh.f32 %v2513_v18 }
0x1ee2   :  { %v3768_v19 = vpop.eup %3767 }
0x1ee3   :  { %2517 = vrot.lane.b32.xlu0 %v3768_v19, %s3798_s17 }
0x1f55   :  { %v2518_v5 = vpop.permute.xlu0 %2517 }
0x1f56   :  { %v2520_v22 = vmul.f32 %v2518_v5, %v2515_v20 }
0x1f58   :  { %v2522_v25 = vadd.f32 %v2521_v59, %v2520_v22 }
0x1f5a   :  { %2598 = vrot.lane.b32.xlu1 %v2522_v25, %s3798_s17 }
0x1fcc   :  { %v2599_v4 = vpop.permute.xlu1 %2598 }
0x1fcd   :  { %3636 = vmatmul.mubr.msk.f32.vlgmr.msra.gmra.mxu0 %vm133_vm2, %v2599_v4 }
0x1fce   :  { %3650 = vmatpush3.msra.mxu0 %v4239_v7  ;;  %3657 = vmatprep.mubr.msk.f32.mxu0 %vm3796_vm1, %v3795_v0 }
0x1fcf   :  { %3651 = vmatprep.subr.mxu0 %v3795_v0 }
0x1fd0   :  { %3652 = vmatpush3.msra.mxu0 %v4246_v3 }
0x1fd1   :  { %3653 = vmatprep.subr.mxu0 %v3795_v0 }
0x1fd2   :  { %3654 = vmatpush3.msra.mxu0 %v4255_v23 }
0x1fd3   :  { %3655 = vmatprep.subr.mxu0 %v3795_v0 }
0x1fd4   :  { %3656 = vmatpush3.msra.mxu0 %v4262_v24 }
0x1fd5   :  { %3671 = vmatprep.subr.mxu0 %v3795_v0 }
0x208d   :  { %v2668_v28 = vpop.f32.mrf.mxu0 }
0x208e   :  { %v2669_v30 = vadd.f32 %v4295_v27, %v2668_v28 }
0x208f   :  { %v3637_v31 = vpop.f32.mrf.mxu0 }
0x2090   :  { %2680 = vrot.lane.b32.xlu0 %v2669_v30, %s3797_s12  ;;  %v2672_v34 = vadd.f32 %v2669_v30, %v2594_v32 }
0x2092   :  { %v3204_v35 = vmul.f32 -1.442695, %v2672_v34 }
0x2094   :  { %3769 = vpow2.f32 %v3204_v35 }
0x20a1   :  { %v3770_v36 = vpop.eup %3769 }
0x20a2   :  { %v2676_v37 = vadd.f32 1.0, %v3770_v36 }
0x20a4   :  { %3771 = vrcp.f32 %v2676_v37 }
0x20b1   :  { %v3772_v55 = vpop.eup %3771 }
0x20b2   :  { %v2690_v43 = vsub.f32 1.0, %v3772_v55  ;;  %v2696_v61 = vmul.f32 %v3772_v55, %v2522_v25 }
0x2102   :  { %v2681_v38 = vpop.permute.xlu0 %2680 }
0x2103   :  { %v2683_v39 = vmul.f32 %v3772_v55, %v2681_v38 }
0x2105   :  { %2685 = vrot.lane.b32.xlu1 %v2683_v39, %s3797_s12 }
0x2177   :  { %v2686_v40 = vpop.permute.xlu1 %2685 }
0x2178   :  { %v2688_v41 = vadd.f32 %v2686_v40, %v2594_v32 }
0x217a   :  { %3773 = vtanh.f32 %v2688_v41 }
0x217b   :  { %3775 = vpow2.f32 %v3185_v52  ;;  %v3211_v52 = vld [vmem:[%s4478_s10] ss:$0 sm:$0xff] }
0x2187   :  { %v3774_v42 = vpop.eup %3773 }
0x2188   :  { %2692 = vrot.lane.b32.xlu0 %v3774_v42, %s3798_s17  ;;  %v3776_v54 = vpop.eup %3775 }
0x2189   :  { %v1603_v56 = vadd.f32 1.0, %v3776_v54 }
0x218b   :  { %3777 = vrcp.f32 %v1603_v56 }
0x2198   :  { %v3778_v26 = vpop.eup %3777 }
0x2199   :  { %v1617_v6 = vsub.f32 1.0, %v3778_v26  ;;  %v1623_v8 = vmul.f32 %v3778_v26, %v4230_v21 }
0x21fa   :  { %v2693_v44 = vpop.permute.xlu0 %2692 }
0x21fb   :  { %v2695_v45 = vmul.f32 %v2693_v44, %v2690_v43  ;;  %v3049_v44 = vld [vmem:[%s4477_s9 + $0x8] sm:$0xff] }
0x21fd   :  { %v4400_v46 = vadd.f32 %v2696_v61, %v2695_v45  ;;  %v3048_v61 = vld [vmem:[%s4477_s9] sm:$0xff] }
0x21ff   :  { %2773 = vrot.lane.b32.xlu1 %v4400_v46, %s3798_s17 }
0x2203   :  { %1607 = vrot.lane.b32.xlu1 %v1596_v48, %s3797_s12 }
0x2271   :  { %v2774_v58 = vpop.permute.xlu1 %2773 }
0x2272   :  { %3658 = vmatmul.mubr.msk.f32.vlgmr.msra.gmra.mxu0 %vm133_vm2, %v2774_v58 }
0x2273   :  { %3672 = vmatpush3.msra.mxu0 %v4239_v7  ;;  %3679 = vmatprep.mubr.msk.f32.mxu0 %vm3796_vm1, %v3795_v0 }
0x2274   :  { %3673 = vmatprep.subr.mxu0 %v3795_v0 }
0x2275   :  { %v1608_v60 = vpop.permute.xlu1 %1607  ;;  %3674 = vmatpush3.msra.mxu0 %v4246_v3 }
0x2276   :  { %v1610_v2 = vmul.f32 %v3778_v26, %v1608_v60  ;;  %3675 = vmatprep.subr.mxu0 %v3795_v0 }
0x2277   :  { %3676 = vmatpush3.msra.mxu0 %v4255_v23 }
0x2278   :  { %1612 = vrot.lane.b32.xlu1 %v1610_v2, %s3797_s12  ;;  %3677 = vmatprep.subr.mxu0 %v3795_v0 }
0x2279   :  { %3678 = vmatpush3.msra.mxu0 %v4262_v24  ;;  %v2769_v24 = vadd.f32 %v4304_v33, %v4297_v29 }
0x22ea   :  { %v1613_v7 = vpop.permute.xlu1 %1612 }
0x22eb   :  { %v1615_v57 = vadd.f32 %v1613_v7, %v1513_v50 }
0x22ed   :  { %3779 = vtanh.f32 %v1615_v57 }
0x22fa   :  { %v3780_v9 = vpop.eup %3779 }
0x22fb   :  { %1619 = vrot.lane.b32.xlu1 %v3780_v9, %s3798_s17 }
0x2332   :  { %v2843_v62 = vpop.f32.mrf.mxu0 }
0x2333   :  { %v2844_v3 = vadd.f32 %v4295_v27, %v2843_v62 }
0x2334   :  { %v3659_v63 = vpop.f32.mrf.mxu0 }
0x2335   :  { %2855 = vrot.lane.b32.xlu0 %v2844_v3, %s3797_s12  ;;  %v2847_v12 = vadd.f32 %v2844_v3, %v2769_v24 }
0x2337   :  { %v3207_v13 = vmul.f32 -1.442695, %v2847_v12 }
0x2339   :  { %3781 = vpow2.f32 %v3207_v13 }
0x2346   :  { %v3782_v15 = vpop.eup %3781 }
0x2347   :  { %v2851_v53 = vadd.f32 1.0, %v3782_v15 }
0x2349   :  { %3783 = vrcp.f32 %v2851_v53 }
0x2356   :  { %v3784_v16 = vpop.eup %3783 }
0x2357   :  { %v2865_v20 = vsub.f32 1.0, %v3784_v16  ;;  %v2871_v59 = vmul.f32 %v3784_v16, %v4400_v46 }
0x236d   :  { %v1620_v23 = vpop.permute.xlu1 %1619 }
0x236e   :  { %v1622_v10 = vmul.f32 %v1620_v23, %v1617_v6 }
0x2370   :  { %v1624_v11 = vadd.f32 %v1623_v8, %v1622_v10 }
0x2372   :  { %1626 = vrot.lane.b32.xlu1 %v1624_v11, %s3798_s17 }
0x23a7   :  { %v2856_v17 = vpop.permute.xlu0 %2855 }
0x23a8   :  { %v2858_v14 = vmul.f32 %v3784_v16, %v2856_v17 }
0x23aa   :  { %2860 = vrot.lane.b32.xlu0 %v2858_v14, %s3797_s12 }
0x23e4   :  { %v1627_v1 = vpop.permute.xlu1 %1626 }
0x23e5   :  { %1630 = vst.msk [vmem:[#allocation2 + $0x38] sm:$0xff] %vm133_vm2, %v1627_v1 }
0x23ec   :  { %v2873_v21 = vld [vmem:[#allocation2 + $0x38] sm:$0xff] }
0x23ed   :  { %3669 = vmatmul.mubr.msk.f32.vlgmr.msra.gmra.mxu1 %vm133_vm2, %v2873_v21 }
0x23ee   :  { %3690 = vmatprep.mubr.msk.f32.mxu1 %vm3796_vm1, %v3795_v0 }
0x241c   :  { %v2861_v29 = vpop.permute.xlu0 %2860 }
0x241d   :  { %v2863_v18 = vadd.f32 %v2861_v29, %v2769_v24 }
0x241f   :  { %3785 = vtanh.f32 %v2863_v18 }
0x242c   :  { %v3786_v19 = vpop.eup %3785 }
0x242d   :  { %2867 = vrot.lane.b32.xlu0 %v3786_v19, %s3798_s17 }
0x249f   :  { %v2868_v5 = vpop.permute.xlu0 %2867 }
0x24a0   :  { %v2870_v22 = vmul.f32 %v2868_v5, %v2865_v20 }
0x24a2   :  { %v2872_v25 = vadd.f32 %v2871_v59, %v2870_v22 }
0x24a4   :  { %2948 = vrot.lane.b32.xlu0 %v2872_v25, %s3798_s17 }
0x24ad   :  { %v2943_v4 = vpop.f32.mrf.mxu1 }
0x24ae   :  { %v2944_v35 = vadd.f32 %v4304_v33, %v2943_v4  ;;  %v3050_v33 = vld [vmem:[%s4477_s9 + $0x10] sm:$0xff] }
0x24af   :  { %v3670_v28 = vpop.f32.mrf.mxu1 }
0x2516   :  { %v2949_v30 = vpop.permute.xlu0 %2948 }
0x2517   :  { %3680 = vmatmul.mubr.msk.f32.vlgmr.msra.gmra.mxu0 %vm133_vm2, %v2949_v30 }
0x25d7   :  { %v3018_v31 = vpop.f32.mrf.mxu0 }
0x25d8   :  { %v3019_v32 = vadd.f32 %v4295_v27, %v3018_v31  ;;  %v3051_v27 = vld [vmem:[%s4477_s9 + $0x18] sm:$0xff] }
0x25d9   :  { %v3681_v34 = vpop.f32.mrf.mxu0  ;;  %3683 = vmatpush3.msra.mxu1 %v3051_v27 }
0x25da   :  { %3030 = vrot.lane.b32.xlu0 %v3019_v32, %s3797_s12  ;;  %v3022_v36 = vadd.f32 %v3019_v32, %v2944_v35  ;;  %3684 = vmatprep.subr.mxu1 %v3795_v0 }
0x25db   :  { %3685 = vmatpush3.msra.mxu1 %v3050_v33 }
0x25dc   :  { %v3210_v37 = vmul.f32 -1.442695, %v3022_v36  ;;  %3686 = vmatprep.subr.mxu1 %v3795_v0 }
0x25dd   :  { %3687 = vmatpush3.msra.mxu1 %v3049_v44 }
0x25de   :  { %3787 = vpow2.f32 %v3210_v37  ;;  %3688 = vmatprep.subr.mxu1 %v3795_v0 }
0x25df   :  { %3689 = vmatpush3.msra.mxu1 %v3048_v61 }
0x25eb   :  { %v3788_v55 = vpop.eup %3787 }
0x25ec   :  { %v3026_v38 = vadd.f32 1.0, %v3788_v55 }
0x25ee   :  { %3789 = vrcp.f32 %v3026_v38 }
0x25fb   :  { %v3790_v39 = vpop.eup %3789 }
0x25fc   :  { %v3040_v46 = vsub.f32 1.0, %v3790_v39  ;;  %v3046_v48 = vmul.f32 %v3790_v39, %v2872_v25 }
0x264c   :  { %v3031_v40 = vpop.permute.xlu0 %3030 }
0x264d   :  { %v3033_v41 = vmul.f32 %v3790_v39, %v3031_v40 }
0x264f   :  { %3035 = vrot.lane.b32.xlu1 %v3033_v41, %s3797_s12 }
0x26c1   :  { %v3036_v42 = vpop.permute.xlu1 %3035 }
0x26c2   :  { %v3038_v43 = vadd.f32 %v3036_v42, %v2944_v35 }
0x26c4   :  { %3791 = vtanh.f32 %v3038_v43 }
0x26d1   :  { %v3792_v45 = vpop.eup %3791 }
0x26d2   :  { %3042 = vrot.lane.b32.xlu0 %v3792_v45, %s3798_s17 }
0x2744   :  { %v3043_v47 = vpop.permute.xlu0 %3042 }
0x2745   :  { %v3045_v49 = vmul.f32 %v3043_v47, %v3040_v46 }
0x2747   :  { %v3047_v50 = vadd.f32 %v3046_v48, %v3045_v49 }
0x2749   :  { %3060 = vrot.lane.b32.xlu1 %v3047_v50, %s3798_s17 }
0x27bb   :  { %v3061_v51 = vpop.permute.xlu1 %3060 }
0x27bc   :  { %3691 = vmatmul.mubr.msk.f32.vlgmr.msra.gmra.mxu1 %vm133_vm2, %v3061_v51 }
0x287c   :  { %v3130_v54 = vpop.f32.mrf.mxu1 }
0x287d   :  { %v3131_v0 = vadd.f32 %v3211_v52, %v3130_v54 }
0x287e   :  { %v3692_v56 = vpop.f32.mrf.mxu1 }
0x287f   :  { %3135 = vst.msk [vmem:[%s4479_s11] sm:$0xff] %vm3134_vm3, %v3131_v0 }

</bundles_post_ra>
